<compile_context>
chip_gen: v7x
topology: tpu7x:2x2x1
jax: 0.10.0
libtpu: 0.0.40
codegen_flags: <defaults>
</compile_context>

<pallas_src>
import functools

import jax
import jax.numpy as jnp
from jax import lax
from jax.experimental import pallas as pl
from jax.experimental.pallas import tpu as pltpu


_WIDTHS = (50, 100, 300, 100, 50, 1)


def _round_up(n, m):
    return ((n + m - 1) // m) * m


def mlp_kernel(x_ref,
               w1_ref, b1_ref,
               w2_ref, b2_ref,
               w3_ref, b3_ref,
               w4_ref, b4_ref,
               w5_ref, b5_ref,
               w6_ref, b6_ref,
               o_ref):
    """One batch tile of the whole 6-layer MLP.

    x_ref : (TB, F)   input block, natural batch-major layout (float).
    w*_ref: (out, in) bf16 weights; b*_ref: (out, 1) f32 biases (VMEM resident).
    w6_ref: (50, 1)   f32 column;  b6_ref: (1,) f32 scalar in SMEM.
    o_ref : (1, TB)   lane-dense output row.
    """
    # Layer 1: NT matmul contracting F on the last dim of both operands.
    # This does the batch-major -> feature-major transpose "for free" on the
    # MXU (no host-side x.T / pad pass).
    xb = x_ref[...].astype(jnp.bfloat16)                        # (TB, F) bf16
    h = lax.dot_general(w1_ref[...], xb,
                        dimension_numbers=(((1,), (1,)), ((), ())),
                        preferred_element_type=jnp.float32)      # (50, TB) f32
    h = jnp.maximum(h + b1_ref[...], 0.0)

    def dense_relu(h, w_ref, b_ref):
        # MXU: bf16 x bf16 -> f32 accumulate; bias + ReLU in f32 on the VPU.
        y = jnp.dot(w_ref[...], h.astype(jnp.bfloat16),
                    preferred_element_type=jnp.float32)
        return jnp.maximum(y + b_ref[...], 0.0)

    h = dense_relu(h, w2_ref, b2_ref)    # (100, TB)
    h = dense_relu(h, w3_ref, b3_ref)    # (300, TB)
    h = dense_relu(h, w4_ref, b4_ref)    # (100, TB)
    h = dense_relu(h, w5_ref, b5_ref)    # (50,  TB)

    # Final 50 -> 1 layer: f32 VPU multiply + sublane reduction (keepdims)
    # instead of an M=1 MXU matmul.  Result is the lane-dense (1, TB) output.
    out = jnp.sum(h * w6_ref[...], axis=0, keepdims=True) + b6_ref[0]
    o_ref[...] = out.astype(o_ref.dtype)


def prepare_params(params):
    """One-time conversion of PyTorch-layout params into kernel operands
    (bf16 weights, (out,1) f32 biases, w6 column, scalar b6 for SMEM)."""
    assert len(params) == 6
    flat = []
    for w, b in params[:5]:
        flat.append(w.astype(jnp.bfloat16))                 # (out, in) bf16
        flat.append(b.reshape(-1, 1).astype(jnp.float32))   # (out, 1)  f32
    w6, b6 = params[5]
    flat.append(w6.reshape(-1, 1).astype(jnp.float32))      # (50, 1)   f32
    flat.append(b6.reshape(1).astype(jnp.float32))          # (1,)      f32 SMEM
    return flat


def _select_batch_tile(B, max_tile):
    """Batch tile: multiple of 256 (full MXU N passes on v6e/v7x, divides
    v5e's 128), sized from B so the last block wastes < 256 padded columns,
    and giving >= 2 grid steps whenever B > 256 (v7x has 2 TensorCores)."""
    if B <= 256:
        return _round_up(B, 8)            # single block, full-extent lane dim
    n_steps = max(2, pl.cdiv(B, max_tile))
    return min(max_tile, _round_up(pl.cdiv(B, n_steps), 256))


@functools.partial(jax.jit, static_argnames=("max_tile",))
def mlp_forward(x, flat_params, *, max_tile=2048):
    """x: (B, F) float array.  flat_params: output of prepare_params()."""
    B, F = x.shape
    tb = _select_batch_tile(B, max_tile)
    grid_b = pl.cdiv(B, tb)
    b_out = grid_b * tb                 # padded output -> unmasked lane-dense stores
    assert tb == b_out or tb % 128 == 0  # lane-dim legality of the output block

    def resident(a):
        # Full-array block + constant index_map -> VMEM-resident across grid.
        nd = a.ndim
        return pl.BlockSpec(a.shape, lambda i, _nd=nd: (0,) * _nd)

    in_specs = [pl.BlockSpec((tb, F), lambda i: (i, 0))]             # x (batch-tiled)
    in_specs += [resident(a) for a in flat_params[:-1]]              # weights/biases
    in_specs += [pl.BlockSpec(memory_space=pltpu.MemorySpace.SMEM)]  # scalar b6

    sizes = (F,) + _WIDTHS
    flops = 2 * sum(sizes[i] * sizes[i + 1] for i in range(len(sizes) - 1)) * b_out
    param_bytes = sum(int(a.size) * a.dtype.itemsize for a in flat_params)
    bytes_accessed = int(x.size) * x.dtype.itemsize + b_out * 4 + param_bytes

    out = pl.pallas_call(
        mlp_kernel,
        grid=(grid_b,),
        in_specs=in_specs,
        out_specs=pl.BlockSpec((1, tb), lambda i: (0, i)),
        out_shape=jax.ShapeDtypeStruct((1, b_out), jnp.float32),
        compiler_params=pltpu.CompilerParams(
            dimension_semantics=("parallel",),
            vmem_limit_bytes=32 << 20,
        ),
        cost_estimate=pl.CostEstimate(
            flops=flops, transcendentals=0, bytes_accessed=bytes_accessed),
    )(x, *flat_params)

    return out[0, :B].reshape(B, 1)


def init_params(key, input_size, output_size):
    """nn.Linear-style init: W (out, in), b (out,), uniform +-1/sqrt(fan_in)."""
    sizes = [input_size, 50, 100, 300, 100, 50, output_size]
    params = []
    for i in range(len(sizes) - 1):
        fan_in, fan_out = sizes[i], sizes[i + 1]
        key, kw, kb = jax.random.split(key, 3)
        bound = 1.0 / (fan_in ** 0.5)
        w = jax.random.uniform(kw, (fan_out, fan_in), jnp.float32, -bound, bound)
        b = jax.random.uniform(kb, (fan_out,), jnp.float32, -bound, bound)
        params.append((w, b))
    return params


def reference_forward(x, params):
    """Pure-JAX reference matching the kernel numerics (bf16 MXU, f32 acc)."""
    h = x
    for w, b in params[:-1]:
        y = jnp.dot(h.astype(jnp.bfloat16), w.T.astype(jnp.bfloat16),
                    preferred_element_type=jnp.float32) + b
        h = jnp.maximum(y, 0.0)
    w6, b6 = params[-1]
    return h @ w6.T + b6  # final layer in f32, like the kernel's VPU reduce


if __name__ == "__main__":
    key = jax.random.PRNGKey(0)
    input_size = 9      # number of normalized house features
    output_size = 1

    kp, kx1, kx2, kx3 = jax.random.split(key, 4)
    params = init_params(kp, input_size, output_size)
    flat = prepare_params(params)   # one-time weight cast/reshape (review item)

    # batch=8    : single block, full-extent lane dim.
    # batch=300  : 2 grid steps, non-divisible boundary block (masked DMA path).
    # batch=2500 : large-tile path (tb=1280, 2 grid steps for the v7x megacore).
    for batch, kx in ((8, kx1), (300, kx2), (2500, kx3)):
        x = jax.random.normal(kx, (batch, input_size), jnp.float32)
        out = mlp_forward(x, flat)
        jax.block_until_ready(out)
        ref = reference_forward(x, params)
        assert out.shape == (batch, 1)
        assert jnp.allclose(out, ref, atol=1e-2, rtol=1e-2), f"mismatch (batch={batch})"

    print("KERNEL_OK")
</pallas_src>

<mosaic_0001>
module attributes {stable_mosaic.version = 11 : i64} {
  func.func @mlp_kernel(%arg0: i32, %arg1: memref<8x9xf32, #tpu.memory_space<vmem>>, %arg2: memref<50x9xbf16, #tpu.memory_space<vmem>>, %arg3: memref<50x1xf32, #tpu.memory_space<vmem>>, %arg4: memref<100x50xbf16, #tpu.memory_space<vmem>>, %arg5: memref<100x1xf32, #tpu.memory_space<vmem>>, %arg6: memref<300x100xbf16, #tpu.memory_space<vmem>>, %arg7: memref<300x1xf32, #tpu.memory_space<vmem>>, %arg8: memref<100x300xbf16, #tpu.memory_space<vmem>>, %arg9: memref<100x1xf32, #tpu.memory_space<vmem>>, %arg10: memref<50x100xbf16, #tpu.memory_space<vmem>>, %arg11: memref<50x1xf32, #tpu.memory_space<vmem>>, %arg12: memref<50x1xf32, #tpu.memory_space<vmem>>, %arg13: memref<1xf32, #tpu.memory_space<smem>>, %arg14: memref<1x8xf32, #tpu.memory_space<vmem>>) attributes {dimension_semantics = [#tpu.dimension_semantics<parallel>], iteration_bounds = array<i64: 1>, scalar_prefetch = 0 : i64, scratch_operands = 0 : i64, tpu.core_type = #tpu.core_type<tc>, window_params = [{transform_indices = @transform_0, window_bounds = array<i64: 8, 9>}, {pipeline_mode = #tpu.pipeline_mode<synchronous>, transform_indices = @transform_1, window_bounds = array<i64: 50, 9>}, {pipeline_mode = #tpu.pipeline_mode<synchronous>, transform_indices = @transform_2, window_bounds = array<i64: 50, 1>}, {pipeline_mode = #tpu.pipeline_mode<synchronous>, transform_indices = @transform_3, window_bounds = array<i64: 100, 50>}, {pipeline_mode = #tpu.pipeline_mode<synchronous>, transform_indices = @transform_4, window_bounds = array<i64: 100, 1>}, {pipeline_mode = #tpu.pipeline_mode<synchronous>, transform_indices = @transform_5, window_bounds = array<i64: 300, 100>}, {pipeline_mode = #tpu.pipeline_mode<synchronous>, transform_indices = @transform_6, window_bounds = array<i64: 300, 1>}, {pipeline_mode = #tpu.pipeline_mode<synchronous>, transform_indices = @transform_7, window_bounds = array<i64: 100, 300>}, {pipeline_mode = #tpu.pipeline_mode<synchronous>, transform_indices = @transform_8, window_bounds = array<i64: 100, 1>}, {pipeline_mode = #tpu.pipeline_mode<synchronous>, transform_indices = @transform_9, window_bounds = array<i64: 50, 100>}, {pipeline_mode = #tpu.pipeline_mode<synchronous>, transform_indices = @transform_10, window_bounds = array<i64: 50, 1>}, {pipeline_mode = #tpu.pipeline_mode<synchronous>, transform_indices = @transform_11, window_bounds = array<i64: 50, 1>}, {transform_indices = @transform_12, window_bounds = array<i64: 1>}, {transform_indices = @transform_13, window_bounds = array<i64: 1, 8>}]} {
    %c0 = arith.constant 0 : index
    %c0_0 = arith.constant 0 : index
    %0 = vector.load %arg1[%c0, %c0_0] : memref<8x9xf32, #tpu.memory_space<vmem>>, vector<8x9xf32>
    %1 = arith.truncf %0 : vector<8x9xf32> to vector<8x9xbf16>
    %c0_1 = arith.constant 0 : index
    %c0_2 = arith.constant 0 : index
    %2 = vector.load %arg2[%c0_1, %c0_2] : memref<50x9xbf16, #tpu.memory_space<vmem>>, vector<50x9xbf16>
    %cst = arith.constant dense<0.000000e+00> : vector<50x8xf32>
    %3 = tpu.matmul %2, %1, %cst {dimension_numbers = #tpu.dot_dimension_numbers<[1], [1], [0], [0], [0, 0, 1, 0], [], []>} : vector<50x9xbf16>, vector<8x9xbf16>, vector<50x8xf32> -> vector<50x8xf32>
    %c0_3 = arith.constant 0 : index
    %c0_4 = arith.constant 0 : index
    %4 = vector.load %arg3[%c0_3, %c0_4] : memref<50x1xf32, #tpu.memory_space<vmem>>, vector<50x1xf32>
    %5 = vector.broadcast %4 : vector<50x1xf32> to vector<50x8xf32>
    %6 = arith.addf %3, %5 : vector<50x8xf32>
    %cst_5 = arith.constant 0.000000e+00 : f32
    %7 = vector.broadcast %cst_5 : f32 to vector<50x8xf32>
    %8 = arith.maximumf %6, %7 : vector<50x8xf32>
    %c0_6 = arith.constant 0 : index
    %c0_7 = arith.constant 0 : index
    %9 = vector.load %arg4[%c0_6, %c0_7] : memref<100x50xbf16, #tpu.memory_space<vmem>>, vector<100x50xbf16>
    %10 = arith.truncf %8 : vector<50x8xf32> to vector<50x8xbf16>
    %cst_8 = arith.constant dense<0.000000e+00> : vector<100x8xf32>
    %11 = tpu.matmul %9, %10, %cst_8 {dimension_numbers = #tpu.dot_dimension_numbers<[1], [0], [0], [1], [0, 0, 1, 1], [], []>} : vector<100x50xbf16>, vector<50x8xbf16>, vector<100x8xf32> -> vector<100x8xf32>
    %c0_9 = arith.constant 0 : index
    %c0_10 = arith.constant 0 : index
    %12 = vector.load %arg5[%c0_9, %c0_10] : memref<100x1xf32, #tpu.memory_space<vmem>>, vector<100x1xf32>
    %13 = vector.broadcast %12 : vector<100x1xf32> to vector<100x8xf32>
    %14 = arith.addf %11, %13 : vector<100x8xf32>
    %cst_11 = arith.constant 0.000000e+00 : f32
    %15 = vector.broadcast %cst_11 : f32 to vector<100x8xf32>
    %16 = arith.maximumf %14, %15 : vector<100x8xf32>
    %c0_12 = arith.constant 0 : index
    %c0_13 = arith.constant 0 : index
    %17 = vector.load %arg6[%c0_12, %c0_13] : memref<300x100xbf16, #tpu.memory_space<vmem>>, vector<300x100xbf16>
    %18 = arith.truncf %16 : vector<100x8xf32> to vector<100x8xbf16>
    %cst_14 = arith.constant dense<0.000000e+00> : vector<300x8xf32>
    %19 = tpu.matmul %17, %18, %cst_14 {dimension_numbers = #tpu.dot_dimension_numbers<[1], [0], [0], [1], [0, 0, 1, 1], [], []>} : vector<300x100xbf16>, vector<100x8xbf16>, vector<300x8xf32> -> vector<300x8xf32>
    %c0_15 = arith.constant 0 : index
    %c0_16 = arith.constant 0 : index
    %20 = vector.load %arg7[%c0_15, %c0_16] : memref<300x1xf32, #tpu.memory_space<vmem>>, vector<300x1xf32>
    %21 = vector.broadcast %20 : vector<300x1xf32> to vector<300x8xf32>
    %22 = arith.addf %19, %21 : vector<300x8xf32>
    %cst_17 = arith.constant 0.000000e+00 : f32
    %23 = vector.broadcast %cst_17 : f32 to vector<300x8xf32>
    %24 = arith.maximumf %22, %23 : vector<300x8xf32>
    %c0_18 = arith.constant 0 : index
    %c0_19 = arith.constant 0 : index
    %25 = vector.load %arg8[%c0_18, %c0_19] : memref<100x300xbf16, #tpu.memory_space<vmem>>, vector<100x300xbf16>
    %26 = arith.truncf %24 : vector<300x8xf32> to vector<300x8xbf16>
    %cst_20 = arith.constant dense<0.000000e+00> : vector<100x8xf32>
    %27 = tpu.matmul %25, %26, %cst_20 {dimension_numbers = #tpu.dot_dimension_numbers<[1], [0], [0], [1], [0, 0, 1, 1], [], []>} : vector<100x300xbf16>, vector<300x8xbf16>, vector<100x8xf32> -> vector<100x8xf32>
    %c0_21 = arith.constant 0 : index
    %c0_22 = arith.constant 0 : index
    %28 = vector.load %arg9[%c0_21, %c0_22] : memref<100x1xf32, #tpu.memory_space<vmem>>, vector<100x1xf32>
    %29 = vector.broadcast %28 : vector<100x1xf32> to vector<100x8xf32>
    %30 = arith.addf %27, %29 : vector<100x8xf32>
    %cst_23 = arith.constant 0.000000e+00 : f32
    %31 = vector.broadcast %cst_23 : f32 to vector<100x8xf32>
    %32 = arith.maximumf %30, %31 : vector<100x8xf32>
    %c0_24 = arith.constant 0 : index
    %c0_25 = arith.constant 0 : index
    %33 = vector.load %arg10[%c0_24, %c0_25] : memref<50x100xbf16, #tpu.memory_space<vmem>>, vector<50x100xbf16>
    %34 = arith.truncf %32 : vector<100x8xf32> to vector<100x8xbf16>
    %cst_26 = arith.constant dense<0.000000e+00> : vector<50x8xf32>
    %35 = tpu.matmul %33, %34, %cst_26 {dimension_numbers = #tpu.dot_dimension_numbers<[1], [0], [0], [1], [0, 0, 1, 1], [], []>} : vector<50x100xbf16>, vector<100x8xbf16>, vector<50x8xf32> -> vector<50x8xf32>
    %c0_27 = arith.constant 0 : index
    %c0_28 = arith.constant 0 : index
    %36 = vector.load %arg11[%c0_27, %c0_28] : memref<50x1xf32, #tpu.memory_space<vmem>>, vector<50x1xf32>
    %37 = vector.broadcast %36 : vector<50x1xf32> to vector<50x8xf32>
    %38 = arith.addf %35, %37 : vector<50x8xf32>
    %cst_29 = arith.constant 0.000000e+00 : f32
    %39 = vector.broadcast %cst_29 : f32 to vector<50x8xf32>
    %40 = arith.maximumf %38, %39 : vector<50x8xf32>
    %c0_30 = arith.constant 0 : index
    %c0_31 = arith.constant 0 : index
    %41 = vector.load %arg12[%c0_30, %c0_31] : memref<50x1xf32, #tpu.memory_space<vmem>>, vector<50x1xf32>
    %42 = vector.broadcast %41 : vector<50x1xf32> to vector<50x8xf32>
    %43 = arith.mulf %40, %42 : vector<50x8xf32>
    %cst_32 = arith.constant dense<0.000000e+00> : vector<8xf32>
    %44 = vector.multi_reduction <add>, %43, %cst_32 [0] : vector<50x8xf32> to vector<8xf32>
    %45 = vector.shape_cast %44 : vector<8xf32> to vector<1x8xf32>
    %c0_33 = arith.constant 0 : index
    %46 = memref.load %arg13[%c0_33] : memref<1xf32, #tpu.memory_space<smem>>
    %47 = vector.broadcast %46 : f32 to vector<1x8xf32>
    %48 = arith.addf %45, %47 : vector<1x8xf32>
    %c0_34 = arith.constant 0 : index
    %c0_35 = arith.constant 0 : index
    %49 = vector.load %arg14[%c0_34, %c0_35] : memref<1x8xf32, #tpu.memory_space<vmem>>, vector<1x8xf32>
    tpu.vector_store %arg14[%c0_34, %c0_35], %48 {strides = array<i32>} : memref<1x8xf32, #tpu.memory_space<vmem>>, vector<1x8xf32>,
    return
  }
  func.func @transform_0(%arg0: i32) -> (i32, i32) {
    %c0_i32 = arith.constant 0 : i32
    %c0_i32_0 = arith.constant 0 : i32
    return %arg0, %c0_i32 : i32, i32
  }
  func.func @transform_1(%arg0: i32) -> (i32, i32) {
    %c0_i32 = arith.constant 0 : i32
    %c0_i32_0 = arith.constant 0 : i32
    %c0_i32_1 = arith.constant 0 : i32
    return %c0_i32, %c0_i32_0 : i32, i32
  }
  func.func @transform_2(%arg0: i32) -> (i32, i32) {
    %c0_i32 = arith.constant 0 : i32
    %c0_i32_0 = arith.constant 0 : i32
    %c0_i32_1 = arith.constant 0 : i32
    return %c0_i32, %c0_i32_0 : i32, i32
  }
  func.func @transform_3(%arg0: i32) -> (i32, i32) {
    %c0_i32 = arith.constant 0 : i32
    %c0_i32_0 = arith.constant 0 : i32
    %c0_i32_1 = arith.constant 0 : i32
    return %c0_i32, %c0_i32_0 : i32, i32
  }
  func.func @transform_4(%arg0: i32) -> (i32, i32) {
    %c0_i32 = arith.constant 0 : i32
    %c0_i32_0 = arith.constant 0 : i32
    %c0_i32_1 = arith.constant 0 : i32
    return %c0_i32, %c0_i32_0 : i32, i32
  }
  func.func @transform_5(%arg0: i32) -> (i32, i32) {
    %c0_i32 = arith.constant 0 : i32
    %c0_i32_0 = arith.constant 0 : i32
    %c0_i32_1 = arith.constant 0 : i32
    return %c0_i32, %c0_i32_0 : i32, i32
  }
  func.func @transform_6(%arg0: i32) -> (i32, i32) {
    %c0_i32 = arith.constant 0 : i32
    %c0_i32_0 = arith.constant 0 : i32
    %c0_i32_1 = arith.constant 0 : i32
    return %c0_i32, %c0_i32_0 : i32, i32
  }
  func.func @transform_7(%arg0: i32) -> (i32, i32) {
    %c0_i32 = arith.constant 0 : i32
    %c0_i32_0 = arith.constant 0 : i32
    %c0_i32_1 = arith.constant 0 : i32
    return %c0_i32, %c0_i32_0 : i32, i32
  }
  func.func @transform_8(%arg0: i32) -> (i32, i32) {
    %c0_i32 = arith.constant 0 : i32
    %c0_i32_0 = arith.constant 0 : i32
    %c0_i32_1 = arith.constant 0 : i32
    return %c0_i32, %c0_i32_0 : i32, i32
  }
  func.func @transform_9(%arg0: i32) -> (i32, i32) {
    %c0_i32 = arith.constant 0 : i32
    %c0_i32_0 = arith.constant 0 : i32
    %c0_i32_1 = arith.constant 0 : i32
    return %c0_i32, %c0_i32_0 : i32, i32
  }
  func.func @transform_10(%arg0: i32) -> (i32, i32) {
    %c0_i32 = arith.constant 0 : i32
    %c0_i32_0 = arith.constant 0 : i32
    %c0_i32_1 = arith.constant 0 : i32
    return %c0_i32, %c0_i32_0 : i32, i32
  }
  func.func @transform_11(%arg0: i32) -> (i32, i32) {
    %c0_i32 = arith.constant 0 : i32
    %c0_i32_0 = arith.constant 0 : i32
    %c0_i32_1 = arith.constant 0 : i32
    return %c0_i32, %c0_i32_0 : i32, i32
  }
  func.func @transform_12(%arg0: i32) -> i32 {
    %c0_i32 = arith.constant 0 : i32
    %c0_i32_0 = arith.constant 0 : i32
    return %c0_i32 : i32
  }
  func.func @transform_13(%arg0: i32) -> (i32, i32) {
    %c0_i32 = arith.constant 0 : i32
    %c0_i32_0 = arith.constant 0 : i32
    return %c0_i32, %arg0 : i32, i32
  }
}

</mosaic_0001>

<bundles_post_ra>
// kernel: mlp_forward.1
= control target key start
LH: loop header
LB: loop body
LE: loop exit
PB: predicated region body
PF: predicated region fallthrough
CT: control target
= control target key end

     0   :  { %vm116_vm0 = vcmask 72704   ;;  %v2315_v3 = vmov 0   ;;  %s3050_s0 = inlined_call_operand.vmem [shape: f32[8,9], index: 0, kind: input, shape index: {}]   ;;  %s3051_s1 = inlined_call_operand.vmem [shape: bf16[50,9], index: 1, kind: input, shape index: {}]   ;;  %s3052_s2 = inlined_call_operand.vmem [shape: f32[50,1], index: 2, kind: input, shape index: {}]   ;;  %s3053_s3 = inlined_call_operand.vmem [shape: bf16[100,50], index: 3, kind: input, shape index: {}]   ;;  %s3054_s4 = inlined_call_operand.vmem [shape: f32[100,1], index: 4, kind: input, shape index: {}]   ;;  %s3055_s5 = inlined_call_operand.vmem [shape: bf16[300,100], index: 5, kind: input, shape index: {}]   ;;  %s3056_s6 = inlined_call_operand.vmem [shape: f32[300,1], index: 6, kind: input, shape index: {}]   ;;  %s3057_s7 = inlined_call_operand.vmem [shape: bf16[100,300], index: 7, kind: input, shape index: {}]   ;;  %s3058_s8 = inlined_call_operand.vmem [shape: f32[100,1], index: 8, kind: input, shape index: {}]   ;;  %s3059_s9 = inlined_call_operand.vmem [shape: bf16[50,100], index: 9, kind: input, shape index: {}]   ;;  %s3060_s10 = inlined_call_operand.vmem [shape: f32[50,1], index: 10, kind: input, shape index: {}]   ;;  %s3061_s11 = inlined_call_operand.vmem [shape: f32[50,1], index: 11, kind: input, shape index: {}]   ;;  %s3062_s12 = inlined_call_operand.<no memory space> [shape: f32[1], index: 12, kind: input, shape index: {}]   ;;  %s3063_s13 = inlined_call_operand.hbm [shape: f32[1,8], index: 13, kind: output, shape index: {}]  }
   0x1   :  { %v58_v0 = vld [vmem:[%s3052_s2 + $0x10] sm:$0xff]  ;;  %v56_v1 = vld [vmem:[%s3052_s2] sm:$0xff]  ;;  %2229 = vset.pattern.permute.xlu1 %v2315_v3  ;;  %2228 = vset.pattern.permute.xlu0 %v2315_v3  ;;  %v59_v5 = vld [vmem:[%s3052_s2 + $0x18] sm:$0xff] }
   0x2   :  { %v47_v2 = vld [vmem:[%s3050_s0] sm:$0xff]  ;;  %75 = vperm.xlu1 %2229, %v58_v0   ;;  %65 = vperm.xlu0 %2228, %v56_v1   ;;  %v57_v6 = vld [vmem:[%s3052_s2 + $0x8] sm:$0xff]  ;;  %v2232_v12 = vld [vmem:[%s3051_s1 + $0x10] sm:$0xff]  }
   0x3   :  { %v48_v4 = vpack.c.bf16 %v47_v2, %v47_v2  ;;  %v2230_v8 = vld [vmem:[%s3051_s1] sm:$0xff]   ;;  %v61_v9 = vld [vmem:[%s3052_s2 + $0x28] sm:$0xff]  ;;  %v62_v14 = vld [vmem:[%s3052_s2 + $0x30] sm:$0x3] }
   0x4   :  { %2017 = vmatprep.mubr.msk.bf16.mxu0 %vm116_vm0, %v2230_v8  ;;  %v60_v10 = vld [vmem:[%s3052_s2 + $0x20] sm:$0xff]  ;;  %v2231_v11 = vld [vmem:[%s3051_s1 + $0x8] sm:$0xff]   ;;  %v222_v15 = vld [vmem:[%s3054_s4 + $0x10] sm:$0xff] }
   0x5   :  { %2221 = vmatprep.subr.msk.bf16.mxu0 %vm116_vm0, %v48_v4  ;;  %v130_v7 = vsel %vm116_vm0, %v48_v4, 0  ;;  %v220_v13 = vld [vmem:[%s3054_s4] sm:$0xff]  ;;  %v221_v16 = vld [vmem:[%s3054_s4 + $0x8] sm:$0xff]  ;;  %v2233_v17 = vld [vmem:[%s3051_s1 + $0x18] ss:$0 sps:$4 sm:$0x11]  }
   0x6   :  { %2016 = vmatpush3.bf16.xpose.msra.mxu0 %v130_v7  ;;  %80 = vperm.xlu1 %2229, %v59_v5   ;;  %v224_v18 = vld [vmem:[%s3054_s4 + $0x20] sm:$0xff]  ;;  %v223_v19 = vld [vmem:[%s3054_s4 + $0x18] sm:$0xff]  ;;  %v226_v20 = vld [vmem:[%s3054_s4 + $0x30] sm:$0xff] }
   0x7   :  { %70 = vperm.xlu0 %2228, %v57_v6   ;;  %v225_v21 = vld [vmem:[%s3054_s4 + $0x28] sm:$0xff]  ;;  %v228_v22 = vld [vmem:[%s3054_s4 + $0x40] sm:$0xff]  ;;  %v227_v23 = vld [vmem:[%s3054_s4 + $0x38] sm:$0xff] }
   0x8   :  { %v230_v24 = vld [vmem:[%s3054_s4 + $0x50] sm:$0xff]  ;;  %v229_v25 = vld [vmem:[%s3054_s4 + $0x48] sm:$0xff]  ;;  %v232_v26 = vld [vmem:[%s3054_s4 + $0x60] sm:$0xf] }
   0x9   :  { %v231_v27 = vld [vmem:[%s3054_s4 + $0x58] sm:$0xff]  ;;  %v520_v28 = vld [vmem:[%s3056_s6 + $0x88] sm:$0xff]  ;;  %v519_v29 = vld [vmem:[%s3056_s6 + $0x80] sm:$0xff] }
   0xa   :  { %90 = vperm.xlu1 %2229, %v61_v9   ;;  %v504_v30 = vld [vmem:[%s3056_s6 + $0x8] sm:$0xff]  ;;  %v503_v31 = vld [vmem:[%s3056_s6] sm:$0xff]  ;;  %v522_v32 = vld [vmem:[%s3056_s6 + $0x98] sm:$0xff] }
   0xb   :  { %85 = vperm.xlu0 %2228, %v60_v10   ;;  %v521_v33 = vld [vmem:[%s3056_s6 + $0x90] sm:$0xff]  ;;  %v506_v34 = vld [vmem:[%s3056_s6 + $0x18] sm:$0xff]  ;;  %v524_v36 = vld [vmem:[%s3056_s6 + $0xa8] sm:$0xff] }
   0xc   :  { %v505_v35 = vld [vmem:[%s3056_s6 + $0x10] sm:$0xff]  ;;  %v523_v37 = vld [vmem:[%s3056_s6 + $0xa0] sm:$0xff]  ;;  %v508_v38 = vld [vmem:[%s3056_s6 + $0x28] sm:$0xff] }
   0xd   :  { %2018 = vmatmul.mubr.msk.bf16.vlgmr.msra.gmra.mrb[0].mxu0 %vm116_vm0, %v2231_v11  ;;  %v507_v39 = vld [vmem:[%s3056_s6 + $0x20] sm:$0xff] }
   0xe   :  { %2021 = vmatprep.mubr.msk.bf16.mxu0 %vm116_vm0, %v2232_v12  ;;  %235 = vperm.xlu1 %2229, %v220_v13  }
   0xf   :  { %95 = vperm.xlu0 %2228, %v62_v14  }
  0x12   :  { %245 = vperm.xlu1 %2229, %v222_v15  }
  0x13   :  { %240 = vperm.xlu0 %2228, %v221_v16  }
  0x15   :  { %2022 = vmatmul.mubr.msk.bf16.gmra.mrb[4].mxu0 %vm116_vm0, %v2233_v17 }
  0x16   :  { %255 = vperm.xlu1 %2229, %v224_v18  }
  0x17   :  { %250 = vperm.xlu0 %2228, %v223_v19  }
  0x1a   :  { %265 = vperm.xlu1 %2229, %v226_v20  }
  0x1b   :  { %260 = vperm.xlu0 %2228, %v225_v21  }
  0x1e   :  { %275 = vperm.xlu1 %2229, %v228_v22  }
  0x1f   :  { %270 = vperm.xlu0 %2228, %v227_v23  }
  0x22   :  { %285 = vperm.xlu1 %2229, %v230_v24  }
  0x23   :  { %280 = vperm.xlu0 %2228, %v229_v25  }
  0x26   :  { %295 = vperm.xlu1 %2229, %v232_v26  }
  0x27   :  { %290 = vperm.xlu0 %2228, %v231_v27  }
  0x2a   :  { %628 = vperm.xlu1 %2229, %v520_v28  }
  0x2b   :  { %623 = vperm.xlu0 %2228, %v519_v29  }
  0x2e   :  { %548 = vperm.xlu1 %2229, %v504_v30  }
  0x2f   :  { %543 = vperm.xlu0 %2228, %v503_v31  }
  0x32   :  { %638 = vperm.xlu1 %2229, %v522_v32  }
  0x33   :  { %633 = vperm.xlu0 %2228, %v521_v33  }
  0x36   :  { %558 = vperm.xlu1 %2229, %v506_v34  }
  0x37   :  { %553 = vperm.xlu0 %2228, %v505_v35  }
  0x3a   :  { %648 = vperm.xlu1 %2229, %v524_v36  }
  0x3b   :  { %643 = vperm.xlu0 %2228, %v523_v37  }
  0x3c   :  { %19 = vsyncpa [#allocation4], 0  ;;  %v526_v40 = vld [vmem:[%s3056_s6 + $0xb8] sm:$0xff]  ;;  %v525_v41 = vld [vmem:[%s3056_s6 + $0xb0] sm:$0xff]  ;;  %v2316_v62 = vmov 0.0   ;;  %vm2317_vm1 = vmmov 0  }
  0x3d   :  { %v510_v42 = vld [vmem:[%s3056_s6 + $0x38] sm:$0xff]  ;;  %v509_v43 = vld [vmem:[%s3056_s6 + $0x30] sm:$0xff]  ;;  %v528_v44 = vld [vmem:[%s3056_s6 + $0xc8] sm:$0xff]  ;;  %2025 = vmatprep.subr.bf16.mxu1 %v2316_v62  ;;  %2061 = vmatprep.subr.bf16.mxu0 %v2316_v62  ;;  %vm353_vm2 = vcmask 1040384   ;;  %vm331_vm3 = vcmask 408576   ;;  %vm884_vm4 = vcmask 1041408  }
  0x3e   :  { %568 = vperm.xlu1 %2229, %v508_v38   ;;  %v527_v45 = vld [vmem:[%s3056_s6 + $0xc0] sm:$0xff]  ;;  %v512_v46 = vld [vmem:[%s3056_s6 + $0x48] sm:$0xff]  ;;  %v530_v48 = vld [vmem:[%s3056_s6 + $0xd8] sm:$0xff]  ;;  %2033 = vmatprep.mubr.msk.bf16.mxu1 %vm2317_vm1, %v2316_v62  ;;  %vm826_vm5 = vcmask 818176   ;;  %vm1356_vm6 = vcmask 1045504   ;;  %vm1334_vm7 = vcmask 359424  }
  0x3f   :  { %563 = vperm.xlu0 %2228, %v507_v39   ;;  %v511_v47 = vld [vmem:[%s3056_s6 + $0x40] sm:$0xff]  ;;  %v529_v49 = vld [vmem:[%s3056_s6 + $0xd0] sm:$0xff]  ;;  %v514_v50 = vld [vmem:[%s3056_s6 + $0x58] sm:$0xff]  ;;  %2075 = vmatprep.mubr.msk.bf16.mxu0 %vm2317_vm1, %v2316_v62  ;;  %vm1758_vm8 = vcmask 64512   ;;  %vm1770_vm9 = vcmask 58368   ;;  %s2318_s15 = smov [#allocation3]  }
  0x40   :  { %v513_v51 = vld [vmem:[%s3056_s6 + $0x50] sm:$0xff]  ;;  %v532_v52 = vld [vmem:[%s3056_s6 + $0xe8] sm:$0xff]  ;;  %v531_v53 = vld [vmem:[%s3056_s6 + $0xe0] sm:$0xff]  ;;  %s1790_s16 = sshll.u32 %s2318_s15, 4  ;;  %vm1782_vm10 = vcmask 57344   ;;  %s1791_s16 = int_to_ptr.vmem [resolvable:$true] %s1790_s16 }
  0x41   :  { %v516_v54 = vld [vmem:[%s3056_s6 + $0x68] sm:$0xff]  ;;  %v515_v55 = vld [vmem:[%s3056_s6 + $0x60] sm:$0xff]  ;;  %v534_v56 = vld [vmem:[%s3056_s6 + $0xf8] sm:$0xff]  ;;  %s2291_s17 = scalar_lea.vmem %s1791_s16, 16  ;;  %s2295_s0 = scalar_lea.vmem %s1791_s16, 32 }
  0x42   :  { %658 = vperm.xlu1 %2229, %v526_v40   ;;  %v533_v57 = vld [vmem:[%s3056_s6 + $0xf0] sm:$0xff]  ;;  %v518_v58 = vld [vmem:[%s3056_s6 + $0x78] sm:$0xff]  ;;  %v536_v60 = vld [vmem:[%s3056_s6 + $0x108] sm:$0xff]  ;;  %p2292_p0 = scmp.ne.s32.totalorder %s1791_s16, %s2291_s17  ;;  %p2296_p1 = scmp.lt.s32.totalorder %s1791_s16, %s1791_s16 }
  0x43   :  { %653 = vperm.xlu0 %2228, %v525_v41   ;;  %v517_v59 = vld [vmem:[%s3056_s6 + $0x70] sm:$0xff]  ;;  %v535_v61 = vld [vmem:[%s3056_s6 + $0x100] sm:$0xff]  ;;  %v538_v63 = vld [vmem:[%s3056_s6 + $0x118] sm:$0xff]  ;;  %p2297_p2 = scmp.lt.s32.totalorder %s2295_s0, %s2291_s17 }
  0x44   :  { %v537_v0 = vld [vmem:[%s3056_s6 + $0x110] sm:$0xff]  ;;  %v540_v1 = vld [vmem:[%s3056_s6 + $0x128] sm:$0xf]  ;;  %v539_v2 = vld [vmem:[%s3056_s6 + $0x120] sm:$0xff] }
  0x45   :  { %v1157_v3 = vld [vmem:[%s3058_s8 + $0x8] sm:$0xff]  ;;  %v1156_v4 = vld [vmem:[%s3058_s8] sm:$0xff]  ;;  %v1159_v5 = vld [vmem:[%s3058_s8 + $0x18] sm:$0xff]  ;;  %p2298_p3 = por %p2297_p2, %p2296_p1 }
  0x46   :  { %578 = vperm.xlu1 %2229, %v510_v42   ;;  %v1158_v6 = vld [vmem:[%s3058_s8 + $0x10] sm:$0xff]  ;;  %v1161_v7 = vld [vmem:[%s3058_s8 + $0x28] sm:$0xff]  ;;  %v1160_v8 = vld [vmem:[%s3058_s8 + $0x20] sm:$0xff] }
  0x47   :  { %573 = vperm.xlu0 %2228, %v509_v43   ;;  %v1163_v9 = vld [vmem:[%s3058_s8 + $0x38] sm:$0xff]  ;;  %v1162_v10 = vld [vmem:[%s3058_s8 + $0x30] sm:$0xff]  ;;  %v1165_v11 = vld [vmem:[%s3058_s8 + $0x48] sm:$0xff]  ;;  %p2299_p4 = pnand %p2298_p3, %p2292_p0 }
  0x48   :  { %v1164_v12 = vld [vmem:[%s3058_s8 + $0x40] sm:$0xff]  ;;  %v1167_v13 = vld [vmem:[%s3058_s8 + $0x58] sm:$0xff]  ;;  %v1166_v14 = vld [vmem:[%s3058_s8 + $0x50] sm:$0xff] }
  0x49   :  { %v1563_v15 = vld [vmem:[%s3060_s10] sm:$0xff]  ;;  %v1565_v17 = vld [vmem:[%s3060_s10 + $0x10] sm:$0xff]  ;;  %v1564_v18 = vld [vmem:[%s3060_s10 + $0x8] sm:$0xff] }
  0x4a   :  { %668 = vperm.xlu1 %2229, %v528_v44   ;;  %v1168_v16 = vld [vmem:[%s3058_s8 + $0x60] sm:$0xf]  ;;  %v1566_v20 = vld [vmem:[%s3060_s10 + $0x18] sm:$0xff]  ;;  %v1710_v22 = vld [vmem:[%s3061_s11 + $0x8] sm:$0xff] }
  0x4b   :  { %663 = vperm.xlu0 %2228, %v527_v45   ;;  %v1709_v19 = vld [vmem:[%s3061_s11] sm:$0xff]  ;;  %v1568_v23 = vld [vmem:[%s3060_s10 + $0x28] sm:$0xff]  ;;  %v1711_v24 = vld [vmem:[%s3061_s11 + $0x10] sm:$0xff] }
  0x4c   :  { %v1567_v21 = vld [vmem:[%s3060_s10 + $0x20] sm:$0xff]  ;;  %v1569_v25 = vld [vmem:[%s3060_s10 + $0x30] sm:$0x3]  ;;  %v1712_v26 = vld [vmem:[%s3061_s11 + $0x18] sm:$0xff] }
  0x4d   :  { %v1714_v27 = vld [vmem:[%s3061_s11 + $0x28] sm:$0xff]  ;;  %v1713_v28 = vld [vmem:[%s3061_s11 + $0x20] sm:$0xff]  ;;  %v1715_v29 = vld [vmem:[%s3061_s11 + $0x30] sm:$0x3] }
  0x4e   :  { %588 = vperm.xlu1 %2229, %v512_v46  }
  0x4f   :  { %583 = vperm.xlu0 %2228, %v511_v47  }
  0x52   :  { %678 = vperm.xlu1 %2229, %v530_v48  }
  0x53   :  { %673 = vperm.xlu0 %2228, %v529_v49  }
  0x56   :  { %598 = vperm.xlu1 %2229, %v514_v50  }
  0x57   :  { %593 = vperm.xlu0 %2228, %v513_v51  }
  0x5a   :  { %688 = vperm.xlu1 %2229, %v532_v52  }
  0x5b   :  { %683 = vperm.xlu0 %2228, %v531_v53  }
  0x5e   :  { %608 = vperm.xlu1 %2229, %v516_v54  }
  0x5f   :  { %603 = vperm.xlu0 %2228, %v515_v55  }
  0x62   :  { %698 = vperm.xlu1 %2229, %v534_v56  }
  0x63   :  { %693 = vperm.xlu0 %2228, %v533_v57  }
  0x66   :  { %618 = vperm.xlu1 %2229, %v518_v58  }
  0x67   :  { %613 = vperm.xlu0 %2228, %v517_v59  }
  0x6a   :  { %708 = vperm.xlu1 %2229, %v536_v60  }
  0x6b   :  { %703 = vperm.xlu0 %2228, %v535_v61  }
  0x6e   :  { %718 = vperm.xlu1 %2229, %v538_v63  }
  0x6f   :  { %713 = vperm.xlu0 %2228, %v537_v0  }
  0x72   :  { %728 = vperm.xlu1 %2229, %v540_v1   ;;  %v2234_v1 = vld [vmem:[%s3053_s3] sm:$0xff]  }
  0x73   :  { %723 = vperm.xlu0 %2228, %v539_v2   ;;  %v2235_v2 = vld [vmem:[%s3053_s3 + $0x8] sm:$0xff]  }
  0x76   :  { %1176 = vperm.xlu1 %2229, %v1157_v3   ;;  %v2236_v3 = vld [vmem:[%s3053_s3 + $0x10] sm:$0xff]  }
  0x77   :  { %1171 = vperm.xlu0 %2228, %v1156_v4   ;;  %v2237_v4 = vld [vmem:[%s3053_s3 + $0x18] sm:$0xff]  }
  0x7a   :  { %1186 = vperm.xlu1 %2229, %v1159_v5   ;;  %v2238_v5 = vld [vmem:[%s3053_s3 + $0x20] sm:$0xff]  }
  0x7b   :  { %1181 = vperm.xlu0 %2228, %v1158_v6   ;;  %v2239_v6 = vld [vmem:[%s3053_s3 + $0x28] sm:$0xff]  }
  0x7e   :  { %1196 = vperm.xlu1 %2229, %v1161_v7   ;;  %v2240_v7 = vld [vmem:[%s3053_s3 + $0x30] ss:$0 sps:$4 sm:$0x33]  }
  0x7f   :  { %1191 = vperm.xlu0 %2228, %v1160_v8  }
  0x81   :  { %v66_v30 = vpop.permute.xlu0 %65  ;;  %v76_v31 = vpop.permute.xlu1 %75 }
  0x82   :  { %1206 = vperm.xlu1 %2229, %v1163_v9  }
  0x83   :  { %1201 = vperm.xlu0 %2228, %v1162_v10  }
  0x85   :  { %v81_v36 = vpop.permute.xlu1 %80 }
  0x86   :  { %1216 = vperm.xlu1 %2229, %v1165_v11   ;;  %v71_v32 = vpop.permute.xlu0 %70 }
  0x87   :  { %1211 = vperm.xlu0 %2228, %v1164_v12  }
  0x89   :  { %v91_v55 = vpop.permute.xlu1 %90 }
  0x8a   :  { %1226 = vperm.xlu1 %2229, %v1167_v13   ;;  %v86_v38 = vpop.permute.xlu0 %85 }
  0x8b   :  { %1221 = vperm.xlu0 %2228, %v1166_v14  }
  0x8d   :  { %v236_v8 = vpop.permute.xlu1 %235 }
  0x8e   :  { %1572 = vperm.xlu1 %2229, %v1563_v15   ;;  %v96_v49 = vpop.permute.xlu0 %95 }
  0x8f   :  { %1231 = vperm.xlu0 %2228, %v1168_v16  }
  0x92   :  { %1582 = vperm.xlu1 %2229, %v1565_v17   ;;  %v241_v12 = vpop.permute.xlu0 %240 }
  0x93   :  { %1577 = vperm.xlu0 %2228, %v1564_v18  }
  0x96   :  { %1718 = vperm.xlu1 %2229, %v1709_v19   ;;  %v246_v19 = vpop.permute.xlu1 %245 }
  0x97   :  { %1587 = vperm.xlu0 %2228, %v1566_v20  }
  0x9a   :  { %1592 = vperm.xlu1 %2229, %v1567_v21  }
  0x9b   :  { %1723 = vperm.xlu0 %2228, %v1710_v22  }
  0x9e   :  { %1597 = vperm.xlu1 %2229, %v1568_v23   ;;  %v251_v23 = vpop.permute.xlu0 %250 }
  0x9f   :  { %1728 = vperm.xlu0 %2228, %v1711_v24  }
  0xa2   :  { %1602 = vperm.xlu1 %2229, %v1569_v25  }
  0xa3   :  { %1733 = vperm.xlu0 %2228, %v1712_v26  }
  0xa6   :  { %1743 = vperm.xlu1 %2229, %v1714_v27  }
  0xa7   :  { %1738 = vperm.xlu0 %2228, %v1713_v28  }
  0xab   :  { %1748 = vperm.xlu0 %2228, %v1715_v29  }
  0xe0   :  { %v2019_v33 = vpop.f32.mrb[0].mxu0 }
  0xe1   :  { %v175_v34 = vadd.f32 %v2019_v33, %v76_v31  ;;  %v166_v35 = vpop.f32.mrb[1].mxu0 }
  0xe2   :  { %v2020_v37 = vpop.f32.mrb[2].mxu0  ;;  %v167_v39 = vadd.f32 %v166_v35, %v66_v30  ;;  %v256_v30 = vpop.permute.xlu1 %255 }
  0xe3   :  { %v178_v40 = vadd.f32 %v2020_v37, %v81_v36  ;;  %v169_v41 = vpop.f32.mrb[3].mxu0  ;;  %v198_v42 = vmax.f32 %v175_v34, 0.0  ;;  %v261_v34 = vpop.permute.xlu0 %260 }
  0xe4   :  { %v170_v44 = vadd.f32 %v169_v41, %v71_v32  ;;  %v196_v45 = vmax.f32 %v167_v39, 0.0 }
  0xe5   :  { %v199_v43 = vmax.f32 %v178_v40, 0.0 }
  0xe6   :  { %v197_v47 = vmax.f32 %v170_v44, 0.0  ;;  %v266_v41 = vpop.permute.xlu1 %265 }
  0xe7   :  { %v217_v46 = vpack.c.bf16 %v199_v43, %v198_v42 }
  0xe8   :  { %v2023_v48 = vpop.f32.mrb[4].mxu0  ;;  %v216_v51 = vpack.c.bf16 %v197_v47, %v196_v45  ;;  %v271_v45 = vpop.permute.xlu0 %270 }
  0xe9   :  { %v182_v50 = vpop.f32.mrb[5].mxu0  ;;  %v191_v52 = vadd.f32 %v2023_v48, %v96_v49 }
  0xea   :  { %v2024_v53 = vpop.f32.mrb[6].mxu0  ;;  %v183_v54 = vadd.f32 %v182_v50, %v86_v38  ;;  %2026 = vmatpush3.bf16.msra.mxu1 %v216_v51 }
  0xeb   :  { %v185_v56 = vpop.f32.mrb[7].mxu0  ;;  %2027 = vmatprep.subr.bf16.mxu1 %v2316_v62  ;;  %v202_v58 = vmax.f32 %v191_v52, 0.0  ;;  %v276_v52 = vpop.permute.xlu1 %275 }
  0xec   :  { %v186_v57 = vadd.f32 %v185_v56, %v91_v55  ;;  %v200_v59 = vmax.f32 %v183_v54, 0.0  ;;  %v281_v56 = vpop.permute.xlu0 %280 }
  0xed   :  { %v219_v63 = vpack.c.bf16 %v202_v58, %v202_v58 }
  0xee   :  { %v201_v60 = vmax.f32 %v186_v57, 0.0  ;;  %2028 = vmatpush3.bf16.msra.mxu1 %v217_v46 }
  0xef   :  { %2029 = vmatprep.subr.bf16.mxu1 %v2316_v62  ;;  %v355_v0 = vsel %vm353_vm2, %v219_v63, 0 }
  0xf0   :  { %v218_v61 = vpack.c.bf16 %v201_v60, %v200_v59 }
  0xf2   :  { %2030 = vmatpush3.bf16.msra.mxu1 %v218_v61 }
  0xf3   :  { %2031 = vmatprep.subr.bf16.mxu1 %v2316_v62 }
  0xf6   :  { %2032 = vmatpush3.bf16.msra.mxu1 %v355_v0  ;;  %v286_v0 = vpop.permute.xlu1 %285 }
  0xf9   :  { %2034 = vmatmul.mubr.msk.bf16.vlgmr.msra.gmra.mrb[0].mxu1 %vm331_vm3, %v2234_v1 }
  0xfa   :  { %2037 = vmatprep.mubr.msk.bf16.mxu1 %vm2317_vm1, %v2316_v62 }
 0x101   :  { %2038 = vmatmul.mubr.msk.bf16.gmra.mrb[4].mxu1 %vm331_vm3, %v2235_v2 }
 0x102   :  { %2041 = vmatprep.mubr.msk.bf16.mxu1 %vm2317_vm1, %v2316_v62 }
 0x109   :  { %2042 = vmatmul.mubr.msk.bf16.gmra.mrb[8].mxu1 %vm331_vm3, %v2236_v3 }
 0x10a   :  { %2045 = vmatprep.mubr.msk.bf16.mxu1 %vm2317_vm1, %v2316_v62 }
 0x111   :  { %2046 = vmatmul.mubr.msk.bf16.gmra.mrb[12].mxu1 %vm331_vm3, %v2237_v4  ;;  %v291_v4 = vpop.permute.xlu0 %290 }
 0x112   :  { %2049 = vmatprep.mubr.msk.bf16.mxu1 %vm2317_vm1, %v2316_v62 }
 0x119   :  { %2050 = vmatmul.mubr.msk.bf16.gmra.mrb[16].mxu1 %vm331_vm3, %v2238_v5 }
 0x11a   :  { %2053 = vmatprep.mubr.msk.bf16.mxu1 %vm2317_vm1, %v2316_v62 }
 0x121   :  { %2054 = vmatmul.mubr.msk.bf16.gmra.mrb[20].mxu1 %vm331_vm3, %v2239_v6 }
 0x122   :  { %2057 = vmatprep.mubr.msk.bf16.mxu1 %vm2317_vm1, %v2316_v62 }
 0x129   :  { %2058 = vmatmul.mubr.msk.bf16.gmra.mrb[24].mxu1 %vm331_vm3, %v2240_v7 }
 0x1cc   :  { %v391_v9 = vpop.f32.mrb[0].mxu1 }
 0x1cd   :  { %v392_v10 = vadd.f32 %v391_v9, %v236_v8  ;;  %v2035_v11 = vpop.f32.mrb[1].mxu1 }
 0x1ce   :  { %v394_v13 = vpop.f32.mrb[2].mxu1  ;;  %v296_v11 = vpop.permute.xlu1 %295 }
 0x1cf   :  { %v395_v14 = vadd.f32 %v394_v13, %v241_v12  ;;  %v2036_v15 = vpop.f32.mrb[3].mxu1  ;;  %v445_v16 = vmax.f32 %v392_v10, 0.0 }
 0x1d1   :  { %v446_v17 = vmax.f32 %v395_v14, 0.0 }
 0x1d3   :  { %v496_v18 = vpack.c.bf16 %v446_v17, %v445_v16 }
 0x1d4   :  { %v399_v20 = vpop.f32.mrb[4].mxu1 }
 0x1d5   :  { %v400_v21 = vadd.f32 %v399_v20, %v246_v19  ;;  %v2039_v22 = vpop.f32.mrb[5].mxu1  ;;  %2062 = vmatpush3.bf16.msra.mxu0 %v496_v18  ;;  %v2241_v20 = vld [vmem:[%s3055_s5] sm:$0xff]  }
 0x1d6   :  { %v402_v24 = vpop.f32.mrb[6].mxu1  ;;  %2063 = vmatprep.subr.bf16.mxu0 %v2316_v62  ;;  %v2243_v22 = vld [vmem:[%s3055_s5 + $0x10] sm:$0xff]  }
 0x1d7   :  { %v403_v25 = vadd.f32 %v402_v24, %v251_v23  ;;  %v2040_v26 = vpop.f32.mrb[7].mxu1  ;;  %v447_v27 = vmax.f32 %v400_v21, 0.0  ;;  %v2242_v21 = vld [vmem:[%s3055_s5 + $0x8] sm:$0xff]   ;;  %v2244_v23 = vld [vmem:[%s3055_s5 + $0x18] sm:$0xff]   ;;  %v2245_v24 = vld [vmem:[%s3055_s5 + $0x20] sm:$0xff]  }
 0x1d8   :  { %v2247_v26 = vld [vmem:[%s3055_s5 + $0x30] sm:$0xff]  }
 0x1d9   :  { %v448_v28 = vmax.f32 %v403_v25, 0.0  ;;  %v2246_v25 = vld [vmem:[%s3055_s5 + $0x28] sm:$0xff]  }
 0x1db   :  { %v497_v29 = vpack.c.bf16 %v448_v28, %v447_v27  ;;  %v2248_v27 = vld [vmem:[%s3055_s5 + $0x38] sm:$0xff]   ;;  %v2249_v28 = vld [vmem:[%s3055_s5 + $0x40] sm:$0xff]  }
 0x1dc   :  { %v407_v31 = vpop.f32.mrb[8].mxu1 }
 0x1dd   :  { %v408_v32 = vadd.f32 %v407_v31, %v256_v30  ;;  %v2043_v33 = vpop.f32.mrb[9].mxu1  ;;  %2064 = vmatpush3.bf16.msra.mxu0 %v497_v29  ;;  %v2250_v29 = vld [vmem:[%s3055_s5 + $0x48] sm:$0xff]   ;;  %v2251_v30 = vld [vmem:[%s3055_s5 + $0x50] sm:$0xff]   ;;  %v2252_v31 = vld [vmem:[%s3055_s5 + $0x58] sm:$0xff]  }
 0x1de   :  { %v410_v35 = vpop.f32.mrb[10].mxu1  ;;  %2065 = vmatprep.subr.bf16.mxu0 %v2316_v62  ;;  %v2254_v33 = vld [vmem:[%s3055_s5 + $0x68] sm:$0xff]  }
 0x1df   :  { %v411_v36 = vadd.f32 %v410_v35, %v261_v34  ;;  %v2044_v37 = vpop.f32.mrb[11].mxu1  ;;  %v449_v38 = vmax.f32 %v408_v32, 0.0  ;;  %v2253_v32 = vld [vmem:[%s3055_s5 + $0x60] sm:$0xff]   ;;  %v2255_v34 = vld [vmem:[%s3055_s5 + $0x70] sm:$0xff]   ;;  %v2256_v35 = vld [vmem:[%s3055_s5 + $0x78] sm:$0xff]  }
 0x1e0   :  { %v2258_v37 = vld [vmem:[%s3055_s5 + $0x88] sm:$0xff]  }
 0x1e1   :  { %v450_v39 = vmax.f32 %v411_v36, 0.0  ;;  %v2257_v36 = vld [vmem:[%s3055_s5 + $0x80] sm:$0xff]  }
 0x1e3   :  { %v498_v40 = vpack.c.bf16 %v450_v39, %v449_v38  ;;  %v2259_v38 = vld [vmem:[%s3055_s5 + $0x90] sm:$0x3f]   ;;  %v2833_v39 = vpop.permute.xlu0 %623 }
 0x1e4   :  { %v415_v42 = vpop.f32.mrb[12].mxu1 }
 0x1e5   :  { %v416_v43 = vadd.f32 %v415_v42, %v266_v41  ;;  %v2047_v44 = vpop.f32.mrb[13].mxu1  ;;  %2066 = vmatpush3.bf16.msra.mxu0 %v498_v40  ;;  %v2835_v40 = vpop.permute.xlu1 %628 }
 0x1e6   :  { %v418_v46 = vpop.f32.mrb[14].mxu1  ;;  %2067 = vmatprep.subr.bf16.mxu0 %v2316_v62 }
 0x1e7   :  { %v419_v47 = vadd.f32 %v418_v46, %v271_v45  ;;  %v2048_v48 = vpop.f32.mrb[15].mxu1  ;;  %v451_v49 = vmax.f32 %v416_v43, 0.0  ;;  %v544_v41 = vpop.permute.xlu0 %543 }
 0x1e9   :  { %v452_v50 = vmax.f32 %v419_v47, 0.0  ;;  %v549_v42 = vpop.permute.xlu1 %548 }
 0x1eb   :  { %v499_v51 = vpack.c.bf16 %v452_v50, %v451_v49  ;;  %v2837_v43 = vpop.permute.xlu0 %633 }
 0x1ec   :  { %v423_v53 = vpop.f32.mrb[16].mxu1 }
 0x1ed   :  { %v424_v54 = vadd.f32 %v423_v53, %v276_v52  ;;  %v2051_v55 = vpop.f32.mrb[17].mxu1  ;;  %2068 = vmatpush3.bf16.msra.mxu0 %v499_v51  ;;  %v2839_v44 = vpop.permute.xlu1 %638 }
 0x1ee   :  { %v426_v57 = vpop.f32.mrb[18].mxu1  ;;  %2069 = vmatprep.subr.bf16.mxu0 %v2316_v62 }
 0x1ef   :  { %v427_v58 = vadd.f32 %v426_v57, %v281_v56  ;;  %v2052_v59 = vpop.f32.mrb[19].mxu1  ;;  %v453_v60 = vmax.f32 %v424_v54, 0.0  ;;  %v554_v45 = vpop.permute.xlu0 %553  ;;  %v2262_v56 = vld [vmem:[%s3057_s7 + $0x4] ss:$12 sps:$4 sm:$0xff]  }
 0x1f0   :  { %1392 = vmatprep.mubr.bf16.mxu1 %v2262_v56 }
 0x1f1   :  { %v454_v61 = vmax.f32 %v427_v58, 0.0  ;;  %v559_v46 = vpop.permute.xlu1 %558 }
 0x1f3   :  { %v500_v63 = vpack.c.bf16 %v454_v61, %v453_v60  ;;  %v2841_v47 = vpop.permute.xlu0 %643 }
 0x1f4   :  { %v431_v1 = vpop.f32.mrb[20].mxu1 }
 0x1f5   :  { %v432_v2 = vadd.f32 %v431_v1, %v286_v0  ;;  %v2055_v3 = vpop.f32.mrb[21].mxu1  ;;  %2070 = vmatpush3.bf16.msra.mxu0 %v500_v63  ;;  %v2843_v48 = vpop.permute.xlu1 %648 }
 0x1f6   :  { %v434_v5 = vpop.f32.mrb[22].mxu1  ;;  %2071 = vmatprep.subr.bf16.mxu0 %v2316_v62 }
 0x1f7   :  { %v435_v6 = vadd.f32 %v434_v5, %v291_v4  ;;  %v2056_v7 = vpop.f32.mrb[23].mxu1  ;;  %v455_v8 = vmax.f32 %v432_v2, 0.0  ;;  %v564_v49 = vpop.permute.xlu0 %563 }
 0x1f9   :  { %v456_v9 = vmax.f32 %v435_v6, 0.0  ;;  %v569_v50 = vpop.permute.xlu1 %568 }
 0x1fb   :  { %v501_v10 = vpack.c.bf16 %v456_v9, %v455_v8  ;;  %v2845_v54 = vpop.permute.xlu0 %653 }
 0x1fc   :  { %v439_v12 = vpop.f32.mrb[24].mxu1 }
 0x1fd   :  { %v440_v13 = vadd.f32 %v439_v12, %v296_v11  ;;  %v2059_v14 = vpop.f32.mrb[25].mxu1  ;;  %2072 = vmatpush3.bf16.msra.mxu0 %v501_v10  ;;  %v2850_v59 = vpop.permute.xlu1 %658 }
 0x1fe   :  { %v442_v15 = vpop.f32.mrb[26].mxu1  ;;  %2073 = vmatprep.subr.bf16.mxu0 %v2316_v62 }
 0x1ff   :  { %v457_v16 = vmax.f32 %v440_v13, 0.0  ;;  %v2060_v17 = vpop.f32.mrb[27].mxu1  ;;  %v574_v0 = vpop.permute.xlu0 %573 }
 0x201   :  { %v502_v18 = vpack.c.bf16 %v457_v16, %v457_v16  ;;  %v579_v4 = vpop.permute.xlu1 %578 }
 0x203   :  { %v886_v19 = vsel %vm884_vm4, %v502_v18, 0  ;;  %v2854_v10 = vpop.permute.xlu0 %663 }
 0x204   :  { %2074 = vmatpush3.bf16.msra.mxu0 %v886_v19 }
 0x205   :  { %v2858_v12 = vpop.permute.xlu1 %668 }
 0x207   :  { %2076 = vmatmul.mubr.msk.bf16.vlgmr.msra.gmra.mrb[8].mxu0 %vm826_vm5, %v2241_v20  ;;  %v584_v19 = vpop.permute.xlu0 %583 }
 0x208   :  { %2079 = vmatprep.mubr.msk.bf16.mxu0 %vm2317_vm1, %v2316_v62 }
 0x20f   :  { %2080 = vmatmul.mubr.msk.bf16.gmra.mrb[12].mxu0 %vm826_vm5, %v2242_v21 }
 0x210   :  { %2083 = vmatprep.mubr.msk.bf16.mxu0 %vm2317_vm1, %v2316_v62 }
 0x217   :  { %2084 = vmatmul.mubr.msk.bf16.gmra.mrb[16].mxu0 %vm826_vm5, %v2243_v22  ;;  %v589_v22 = vpop.permute.xlu1 %588 }
 0x218   :  { %2087 = vmatprep.mubr.msk.bf16.mxu0 %vm2317_vm1, %v2316_v62 }
 0x21f   :  { %2088 = vmatmul.mubr.msk.bf16.gmra.mrb[20].mxu0 %vm826_vm5, %v2244_v23 }
 0x220   :  { %2091 = vmatprep.mubr.msk.bf16.mxu0 %vm2317_vm1, %v2316_v62 }
 0x227   :  { %2092 = vmatmul.mubr.msk.bf16.gmra.mrb[24].mxu0 %vm826_vm5, %v2245_v24 }
 0x228   :  { %2095 = vmatprep.mubr.msk.bf16.mxu0 %vm2317_vm1, %v2316_v62 }
 0x22f   :  { %2096 = vmatmul.mubr.msk.bf16.gmra.mrb[28].mxu0 %vm826_vm5, %v2246_v25 }
 0x230   :  { %2099 = vmatprep.mubr.msk.bf16.mxu0 %vm2317_vm1, %v2316_v62 }
 0x237   :  { %2100 = vmatmul.mubr.msk.bf16.gmra.mrb[32].mxu0 %vm826_vm5, %v2247_v26 }
 0x238   :  { %2103 = vmatprep.mubr.msk.bf16.mxu0 %vm2317_vm1, %v2316_v62 }
 0x23f   :  { %2104 = vmatmul.mubr.msk.bf16.gmra.mrb[36].mxu0 %vm826_vm5, %v2248_v27  ;;  %v2862_v27 = vpop.permute.xlu0 %673 }
 0x240   :  { %2107 = vmatprep.mubr.msk.bf16.mxu0 %vm2317_vm1, %v2316_v62 }
 0x247   :  { %2108 = vmatmul.mubr.msk.bf16.gmra.mrb[40].mxu0 %vm826_vm5, %v2249_v28 }
 0x248   :  { %2111 = vmatprep.mubr.msk.bf16.mxu0 %vm2317_vm1, %v2316_v62 }
 0x24f   :  { %2112 = vmatmul.mubr.msk.bf16.gmra.mrb[44].mxu0 %vm826_vm5, %v2250_v29 }
 0x250   :  { %2115 = vmatprep.mubr.msk.bf16.mxu0 %vm2317_vm1, %v2316_v62 }
 0x257   :  { %2116 = vmatmul.mubr.msk.bf16.gmra.mrb[48].mxu0 %vm826_vm5, %v2251_v30 }
 0x258   :  { %2119 = vmatprep.mubr.msk.bf16.mxu0 %vm2317_vm1, %v2316_v62 }
 0x25f   :  { %2120 = vmatmul.mubr.msk.bf16.gmra.mrb[52].mxu0 %vm826_vm5, %v2252_v31  ;;  %v2864_v31 = vpop.permute.xlu1 %678 }
 0x260   :  { %2123 = vmatprep.mubr.msk.bf16.mxu0 %vm2317_vm1, %v2316_v62 }
 0x267   :  { %2124 = vmatmul.mubr.msk.bf16.gmra.mrb[56].mxu0 %vm826_vm5, %v2253_v32 }
 0x268   :  { %2127 = vmatprep.mubr.msk.bf16.mxu0 %vm2317_vm1, %v2316_v62 }
 0x26f   :  { %2128 = vmatmul.mubr.msk.bf16.gmra.mrb[60].mxu0 %vm826_vm5, %v2254_v33 }
 0x270   :  { %2131 = vmatprep.mubr.msk.bf16.mxu0 %vm2317_vm1, %v2316_v62 }
 0x277   :  { %2132 = vmatmul.mubr.msk.bf16.gmra.mrb[64].mxu0 %vm826_vm5, %v2255_v34 }
 0x278   :  { %2135 = vmatprep.mubr.msk.bf16.mxu0 %vm2317_vm1, %v2316_v62 }
 0x27f   :  { %2136 = vmatmul.mubr.msk.bf16.gmra.mrb[68].mxu0 %vm826_vm5, %v2256_v35  ;;  %v594_v35 = vpop.permute.xlu0 %593 }
 0x280   :  { %2139 = vmatprep.mubr.msk.bf16.mxu0 %vm2317_vm1, %v2316_v62 }
 0x287   :  { %2140 = vmatmul.mubr.msk.bf16.gmra.mrb[72].mxu0 %vm826_vm5, %v2257_v36 }
 0x288   :  { %2143 = vmatprep.mubr.msk.bf16.mxu0 %vm2317_vm1, %v2316_v62 }
 0x28f   :  { %2144 = vmatmul.mubr.msk.bf16.gmra.mrb[76].mxu0 %vm826_vm5, %v2258_v37 }
 0x290   :  { %2147 = vmatprep.mubr.msk.bf16.mxu0 %vm2317_vm1, %v2316_v62 }
 0x297   :  { %2148 = vmatmul.mubr.msk.bf16.gmra.mrb[80].mxu0 %vm826_vm5, %v2259_v38 }
 0x2da   :  { %v922_v51 = vpop.f32.mrb[8].mxu0 }
 0x2db   :  { %v923_v52 = vadd.f32 %v922_v51, %v544_v41  ;;  %v2077_v53 = vpop.f32.mrb[9].mxu0  ;;  %v599_v41 = vpop.permute.xlu1 %598 }
 0x2dc   :  { %v925_v55 = vpop.f32.mrb[10].mxu0  ;;  %v2868_v51 = vpop.permute.xlu0 %683 }
 0x2dd   :  { %v926_v57 = vadd.f32 %v925_v55, %v549_v42  ;;  %v2078_v58 = vpop.f32.mrb[11].mxu0  ;;  %v1073_v60 = vmax.f32 %v923_v52, 0.0 }
 0x2df   :  { %v1074_v61 = vmax.f32 %v926_v57, 0.0  ;;  %v2872_v53 = vpop.permute.xlu1 %688 }
 0x2e1   :  { %v2852_v63 = vpack.c.bf16 %v1074_v61, %v1073_v60 }
 0x2e2   :  { %v930_v1 = vpop.f32.mrb[12].mxu0 }
 0x2e3   :  { %v931_v2 = vadd.f32 %v930_v1, %v554_v45  ;;  %v2081_v3 = vpop.f32.mrb[13].mxu0 }
 0x2e4   :  { %v933_v5 = vpop.f32.mrb[14].mxu0  ;;  %v609_v3 = vpop.permute.xlu1 %608 }
 0x2e5   :  { %v934_v6 = vadd.f32 %v933_v5, %v559_v46  ;;  %v2082_v7 = vpop.f32.mrb[15].mxu0  ;;  %v1075_v8 = vmax.f32 %v931_v2, 0.0 }
 0x2e7   :  { %v1076_v9 = vmax.f32 %v934_v6, 0.0 }
 0x2e9   :  { %v2856_v11 = vpack.c.bf16 %v1076_v9, %v1075_v8 }
 0x2ea   :  { %v938_v13 = vpop.f32.mrb[16].mxu0 }
 0x2eb   :  { %v939_v14 = vadd.f32 %v938_v13, %v564_v49  ;;  %v2085_v15 = vpop.f32.mrb[17].mxu0 }
 0x2ec   :  { %v941_v16 = vpop.f32.mrb[18].mxu0  ;;  %v2878_v15 = vpop.permute.xlu1 %698 }
 0x2ed   :  { %v942_v17 = vadd.f32 %v941_v16, %v569_v50  ;;  %v2086_v18 = vpop.f32.mrb[19].mxu0  ;;  %v1077_v20 = vmax.f32 %v939_v14, 0.0 }
 0x2ef   :  { %v1078_v21 = vmax.f32 %v942_v17, 0.0 }
 0x2f1   :  { %v2860_v23 = vpack.c.bf16 %v1078_v21, %v1077_v20 }
 0x2f2   :  { %v946_v24 = vpop.f32.mrb[20].mxu0 }
 0x2f3   :  { %v947_v25 = vadd.f32 %v946_v24, %v574_v0  ;;  %v2089_v26 = vpop.f32.mrb[21].mxu0  ;;  %v604_v0 = vpop.permute.xlu0 %603 }
 0x2f4   :  { %v949_v28 = vpop.f32.mrb[22].mxu0  ;;  %v619_v24 = vpop.permute.xlu1 %618 }
 0x2f5   :  { %v950_v29 = vadd.f32 %v949_v28, %v579_v4  ;;  %v2090_v30 = vpop.f32.mrb[23].mxu0  ;;  %v1079_v32 = vmax.f32 %v947_v25, 0.0 }
 0x2f7   :  { %v1080_v33 = vmax.f32 %v950_v29, 0.0  ;;  %v2876_v8 = vpop.permute.xlu0 %693 }
 0x2f9   :  { %v2866_v34 = vpack.c.bf16 %v1080_v33, %v1079_v32 }
 0x2fa   :  { %v954_v36 = vpop.f32.mrb[24].mxu0 }
 0x2fb   :  { %v955_v37 = vadd.f32 %v954_v36, %v584_v19  ;;  %v2093_v38 = vpop.f32.mrb[25].mxu0  ;;  %v614_v19 = vpop.permute.xlu0 %613 }
 0x2fc   :  { %v957_v42 = vpop.f32.mrb[26].mxu0 }
 0x2fd   :  { %v958_v45 = vadd.f32 %v957_v42, %v589_v22  ;;  %v2094_v46 = vpop.f32.mrb[27].mxu0  ;;  %v1081_v49 = vmax.f32 %v955_v37, 0.0 }
 0x2ff   :  { %v1082_v50 = vmax.f32 %v958_v45, 0.0 }
 0x301   :  { %v2870_v52 = vpack.c.bf16 %v1082_v50, %v1081_v49 }
 0x302   :  { %v962_v55 = vpop.f32.mrb[28].mxu0 }
 0x303   :  { %v963_v56 = vadd.f32 %v962_v55, %v594_v35  ;;  %v2097_v57 = vpop.f32.mrb[29].mxu0 }
 0x304   :  { %v965_v58 = vpop.f32.mrb[30].mxu0 }
 0x305   :  { %v966_v60 = vadd.f32 %v965_v58, %v599_v41  ;;  %v2098_v61 = vpop.f32.mrb[31].mxu0  ;;  %v1083_v1 = vmax.f32 %v963_v56, 0.0 }
 0x307   :  { %v1084_v2 = vmax.f32 %v966_v60, 0.0 }
 0x309   :  { %v2874_v4 = vpack.c.bf16 %v1084_v2, %v1083_v1 }
 0x30a   :  { %v970_v5 = vpop.f32.mrb[32].mxu0 }
 0x30b   :  { %v971_v6 = vadd.f32 %v970_v5, %v604_v0  ;;  %v2101_v7 = vpop.f32.mrb[33].mxu0 }
 0x30c   :  { %v973_v9 = vpop.f32.mrb[34].mxu0 }
 0x30d   :  { %v974_v13 = vadd.f32 %v973_v9, %v609_v3  ;;  %v2102_v14 = vpop.f32.mrb[35].mxu0  ;;  %v1085_v16 = vmax.f32 %v971_v6, 0.0 }
 0x30f   :  { %v1086_v17 = vmax.f32 %v974_v13, 0.0 }
 0x311   :  { %v2880_v18 = vpack.c.bf16 %v1086_v17, %v1085_v16 }
 0x312   :  { %v978_v20 = vpop.f32.mrb[36].mxu0 }
 0x313   :  { %v979_v21 = vadd.f32 %v978_v20, %v614_v19  ;;  %v2105_v22 = vpop.f32.mrb[37].mxu0 }
 0x314   :  { %v981_v25 = vpop.f32.mrb[38].mxu0 }
 0x315   :  { %v982_v26 = vadd.f32 %v981_v25, %v619_v24  ;;  %v2106_v28 = vpop.f32.mrb[39].mxu0  ;;  %v1087_v29 = vmax.f32 %v979_v21, 0.0 }
 0x317   :  { %v1088_v30 = vmax.f32 %v982_v26, 0.0 }
 0x319   :  { %v2882_v32 = vpack.c.bf16 %v1088_v30, %v1087_v29 }
 0x31a   :  { %v986_v33 = vpop.f32.mrb[40].mxu0 }
 0x31b   :  { %v987_v35 = vadd.f32 %v986_v33, %v2833_v39  ;;  %v2109_v36 = vpop.f32.mrb[41].mxu0 }
 0x31c   :  { %v989_v37 = vpop.f32.mrb[42].mxu0 }
 0x31d   :  { %v990_v38 = vadd.f32 %v989_v37, %v2835_v40  ;;  %v2110_v41 = vpop.f32.mrb[43].mxu0  ;;  %v1089_v42 = vmax.f32 %v987_v35, 0.0 }
 0x31f   :  { %v1090_v45 = vmax.f32 %v990_v38, 0.0 }
 0x321   :  { %v1145_v46 = vpack.c.bf16 %v1090_v45, %v1089_v42 }
 0x322   :  { %v994_v49 = vpop.f32.mrb[44].mxu0 }
 0x323   :  { %v995_v50 = vadd.f32 %v994_v49, %v2837_v43  ;;  %v2113_v55 = vpop.f32.mrb[45].mxu0  ;;  %1936 = vmatprep.subr.bf16.mxu1 %v1145_v46 }
 0x324   :  { %v997_v56 = vpop.f32.mrb[46].mxu0  ;;  %1937 = vmatpush3.bf16.msra.mxu1 %v2852_v63 }
 0x325   :  { %v998_v57 = vadd.f32 %v997_v56, %v2839_v44  ;;  %v2114_v58 = vpop.f32.mrb[47].mxu0  ;;  %v1091_v39 = vmax.f32 %v995_v50, 0.0 }
 0x326   :  { %v704_v58 = vpop.permute.xlu0 %703 }
 0x327   :  { %v1092_v60 = vmax.f32 %v998_v57, 0.0 }
 0x329   :  { %v1146_v61 = vpack.c.bf16 %v1092_v60, %v1091_v39 }
 0x32a   :  { %v1002_v0 = vpop.f32.mrb[48].mxu0 }
 0x32b   :  { %v1003_v40 = vadd.f32 %v1002_v0, %v2841_v47  ;;  %v2117_v1 = vpop.f32.mrb[49].mxu0  ;;  %1938 = vmatprep.subr.bf16.mxu1 %v1146_v61  ;;  %v709_v61 = vpop.permute.xlu1 %708 }
 0x32c   :  { %v1005_v2 = vpop.f32.mrb[50].mxu0  ;;  %1939 = vmatpush3.bf16.msra.mxu1 %v2856_v11 }
 0x32d   :  { %v1006_v43 = vadd.f32 %v1005_v2, %v2843_v48  ;;  %v2118_v3 = vpop.f32.mrb[51].mxu0  ;;  %v1093_v5 = vmax.f32 %v1003_v40, 0.0 }
 0x32e   :  { %v714_v3 = vpop.permute.xlu0 %713 }
 0x32f   :  { %v1094_v6 = vmax.f32 %v1006_v43, 0.0 }
 0x331   :  { %v1147_v63 = vpack.c.bf16 %v1094_v6, %v1093_v5 }
 0x332   :  { %v1010_v7 = vpop.f32.mrb[52].mxu0 }
 0x333   :  { %v1011_v44 = vadd.f32 %v1010_v7, %v2845_v54  ;;  %v2121_v9 = vpop.f32.mrb[53].mxu0  ;;  %1940 = vmatprep.subr.bf16.mxu1 %v1147_v63  ;;  %v719_v7 = vpop.permute.xlu1 %718 }
 0x334   :  { %v1013_v13 = vpop.f32.mrb[54].mxu0  ;;  %1941 = vmatpush3.bf16.msra.mxu1 %v2860_v23  ;;  %v2266_v9 = vld [vmem:[%s3057_s7 + $0x34] ss:$12 sps:$4 sm:$0xff]  }
 0x335   :  { %v1014_v47 = vadd.f32 %v1013_v13, %v2850_v59  ;;  %v2122_v14 = vpop.f32.mrb[55].mxu0  ;;  %v1095_v16 = vmax.f32 %v1011_v44, 0.0 }
 0x337   :  { %v1096_v17 = vmax.f32 %v1014_v47, 0.0 }
 0x339   :  { %v1148_v11 = vpack.c.bf16 %v1096_v17, %v1095_v16 }
 0x33a   :  { %v1018_v19 = vpop.f32.mrb[56].mxu0 }
 0x33b   :  { %v1019_v48 = vadd.f32 %v1018_v19, %v2854_v10  ;;  %v2125_v20 = vpop.f32.mrb[57].mxu0  ;;  %1942 = vmatprep.subr.bf16.mxu1 %v1148_v11  ;;  %v724_v11 = vpop.permute.xlu0 %723 }
 0x33c   :  { %v1021_v21 = vpop.f32.mrb[58].mxu0  ;;  %1943 = vmatpush3.bf16.msra.mxu1 %v2866_v34 }
 0x33d   :  { %v1022_v54 = vadd.f32 %v1021_v21, %v2858_v12  ;;  %v2126_v22 = vpop.f32.mrb[59].mxu0  ;;  %v1097_v24 = vmax.f32 %v1019_v48, 0.0  ;;  %v2268_v21 = vld [vmem:[%s3057_s7 + $0x30] ss:$12 sps:$4 sm:$0xff]  }
 0x33f   :  { %v1098_v25 = vmax.f32 %v1022_v54, 0.0  ;;  %v729_v54 = vpop.permute.xlu1 %728 }
 0x341   :  { %v1149_v23 = vpack.c.bf16 %v1098_v25, %v1097_v24  ;;  %v2269_v24 = vld [vmem:[%s3057_s7 + $0x4c] ss:$12 sps:$4 sm:$0xff]  }
 0x342   :  { %v1026_v26 = vpop.f32.mrb[60].mxu0 }
 0x343   :  { %v1027_v59 = vadd.f32 %v1026_v26, %v2862_v27  ;;  %v2129_v28 = vpop.f32.mrb[61].mxu0  ;;  %1944 = vmatprep.subr.bf16.mxu1 %v1149_v23 }
 0x344   :  { %v1029_v29 = vpop.f32.mrb[62].mxu0  ;;  %1945 = vmatpush3.bf16.msra.mxu1 %v2870_v52 }
 0x345   :  { %v1030_v10 = vadd.f32 %v1029_v29, %v2864_v31  ;;  %v2130_v30 = vpop.f32.mrb[63].mxu0  ;;  %v1099_v33 = vmax.f32 %v1027_v59, 0.0 }
 0x346   :  { %v2272_v30 = vld [vmem:[%s3057_s7 + $0x64] ss:$12 sps:$4 sm:$0xff]  }
 0x347   :  { %v1100_v35 = vmax.f32 %v1030_v10, 0.0  ;;  %v2271_v10 = vld [vmem:[%s3057_s7 + $0x48] ss:$12 sps:$4 sm:$0xff]  }
 0x349   :  { %v1150_v34 = vpack.c.bf16 %v1100_v35, %v1099_v33  ;;  %v2274_v33 = vld [vmem:[%s3057_s7 + $0x60] ss:$12 sps:$4 sm:$0xff]   ;;  %v2275_v35 = vld [vmem:[%s3057_s7 + $0x7c] ss:$12 sps:$4 sm:$0xff]  }
 0x34a   :  { %v1034_v36 = vpop.f32.mrb[64].mxu0 }
 0x34b   :  { %v1035_v12 = vadd.f32 %v1034_v36, %v2868_v51  ;;  %v2133_v37 = vpop.f32.mrb[65].mxu0  ;;  %1946 = vmatprep.subr.bf16.mxu1 %v1150_v34  ;;  %v1135_v34 = vld [vmem:[%s3057_s7 + $0x90] sm:$0x33]  ;;  %v2277_v36 = vld [vmem:[%s3057_s7 + $0x78] ss:$12 sps:$4 sm:$0xff]  }
 0x34c   :  { %v1037_v38 = vpop.f32.mrb[66].mxu0  ;;  %1947 = vmatpush3.bf16.msra.mxu1 %v2874_v4  ;;  %v1876_v37 = vcombine.low %v1135_v34, %v1135_v34 }
 0x34d   :  { %v1038_v27 = vadd.f32 %v1037_v38, %v2872_v53  ;;  %v2134_v41 = vpop.f32.mrb[67].mxu0  ;;  %v1101_v42 = vmax.f32 %v1035_v12, 0.0  ;;  %v1877_v12 = vcombine.high %v1135_v34, %v1135_v34  ;;  %v2280_v38 = vld [vmem:[%s3057_s7 + $0x8] ss:$12 sps:$4 sm:$0xff]  }
 0x34e   :  { %v2282_v41 = vld [vmem:[%s3057_s7 + $0x38] ss:$12 sps:$4 sm:$0xff]  }
 0x34f   :  { %v1102_v45 = vmax.f32 %v1038_v27, 0.0  ;;  %v2281_v27 = vld [vmem:[%s3057_s7 + $0x20] ss:$12 sps:$4 sm:$0xff]  }
 0x351   :  { %v1151_v52 = vpack.c.bf16 %v1102_v45, %v1101_v42  ;;  %v2283_v42 = vld [vmem:[%s3057_s7 + $0x50] ss:$12 sps:$4 sm:$0xff]   ;;  %v2284_v45 = vld [vmem:[%s3057_s7 + $0x68] ss:$12 sps:$4 sm:$0xff]  }
 0x352   :  { %v1042_v46 = vpop.f32.mrb[68].mxu0 }
 0x353   :  { %v1043_v31 = vadd.f32 %v1042_v46, %v2876_v8  ;;  %v2137_v49 = vpop.f32.mrb[69].mxu0  ;;  %1948 = vmatprep.subr.bf16.mxu1 %v1151_v52  ;;  %v2260_v8 = vld [vmem:[%s3057_s7] ss:$12 sps:$4 sm:$0xff]   ;;  %v2286_v46 = vld [vmem:[%s3057_s7 + $0x98] ss:$0 sps:$4 sm:$0x33]  }
 0x354   :  { %v1045_v50 = vpop.f32.mrb[70].mxu0  ;;  %1949 = vmatpush3.bf16.msra.mxu1 %v2880_v18  ;;  %v2285_v52 = vld [vmem:[%s3057_s7 + $0x80] ss:$12 sps:$4 sm:$0xff]   ;;  %v2288_v49 = vld [vmem:[%s3059_s9 + $0x10] sm:$0xff]  }
 0x355   :  { %v1046_v51 = vadd.f32 %v1045_v50, %v2878_v15  ;;  %v2138_v55 = vpop.f32.mrb[71].mxu0  ;;  %v1103_v56 = vmax.f32 %v1043_v31, 0.0  ;;  %v2263_v15 = vld [vmem:[%s3057_s7 + $0x1c] ss:$12 sps:$4 sm:$0xff]   ;;  %v2287_v31 = vld [vmem:[%s3059_s9] sm:$0xff]  }
 0x356   :  { %2199 = vmatprep.mubr.msk.bf16.mxu0 %vm826_vm5, %v2287_v31 }
 0x357   :  { %v1104_v57 = vmax.f32 %v1046_v51, 0.0 }
 0x359   :  { %v1152_v4 = vpack.c.bf16 %v1104_v57, %v1103_v56 }
 0x35a   :  { %v1050_v53 = vpop.f32.mrb[72].mxu0 }
 0x35b   :  { %v1051_v39 = vadd.f32 %v1050_v53, %v704_v58  ;;  %v2141_v60 = vpop.f32.mrb[73].mxu0  ;;  %1950 = vmatprep.subr.bf16.mxu1 %v1152_v4 }
 0x35c   :  { %v1053_v0 = vpop.f32.mrb[74].mxu0  ;;  %1951 = vmatpush3.bf16.msra.mxu1 %v2882_v32  ;;  %v2265_v32 = vld [vmem:[%s3057_s7 + $0x18] ss:$12 sps:$4 sm:$0xff]  }
 0x35d   :  { %v1054_v18 = vadd.f32 %v1053_v0, %v709_v61  ;;  %v2142_v40 = vpop.f32.mrb[75].mxu0  ;;  %2151 = vmatprep.subr.bf16.mxu1 %v2316_v62  ;;  %v1105_v1 = vmax.f32 %v1051_v39, 0.0 }
 0x35f   :  { %v1106_v2 = vmax.f32 %v1054_v18, 0.0  ;;  %1393 = vmatmul.mubr.bf16.vlgmr.msra.gmra.mrb[28].mxu1 %v2260_v8 }
 0x360   :  { %1400 = vmatprep.mubr.bf16.mxu1 %v2263_v15 }
 0x361   :  { %v1153_v43 = vpack.c.bf16 %v1106_v2, %v1105_v1 }
 0x362   :  { %v1058_v5 = vpop.f32.mrb[76].mxu0 }
 0x363   :  { %v1059_v6 = vadd.f32 %v1058_v5, %v714_v3  ;;  %v2145_v63 = vpop.f32.mrb[77].mxu0  ;;  %2152 = vmatpush3.bf16.msra.mxu1 %v1153_v43 }
 0x364   :  { %v1061_v44 = vpop.f32.mrb[78].mxu0  ;;  %2153 = vmatprep.subr.bf16.mxu1 %v2316_v62 }
 0x365   :  { %v1062_v13 = vadd.f32 %v1061_v44, %v719_v7  ;;  %v2146_v47 = vpop.f32.mrb[79].mxu0  ;;  %v1107_v14 = vmax.f32 %v1059_v6, 0.0 }
 0x367   :  { %v1108_v16 = vmax.f32 %v1062_v13, 0.0  ;;  %1401 = vmatmul.mubr.bf16.gmra.mrb[32].mxu1 %v2265_v32 }
 0x368   :  { %1408 = vmatprep.mubr.bf16.mxu1 %v2266_v9 }
 0x369   :  { %v1154_v17 = vpack.c.bf16 %v1108_v16, %v1107_v14 }
 0x36a   :  { %v1066_v19 = vpop.f32.mrb[80].mxu0 }
 0x36b   :  { %v1067_v48 = vadd.f32 %v1066_v19, %v724_v11  ;;  %v2149_v20 = vpop.f32.mrb[81].mxu0  ;;  %2154 = vmatpush3.bf16.msra.mxu1 %v1154_v17 }
 0x36c   :  { %v1069_v22 = vpop.f32.mrb[82].mxu0  ;;  %2155 = vmatprep.subr.bf16.mxu1 %v2316_v62 }
 0x36d   :  { %v1070_v25 = vadd.f32 %v1069_v22, %v729_v54  ;;  %v2150_v23 = vpop.f32.mrb[83].mxu0  ;;  %v1109_v26 = vmax.f32 %v1067_v48, 0.0 }
 0x36f   :  { %v1110_v59 = vmax.f32 %v1070_v25, 0.0  ;;  %1409 = vmatmul.mubr.bf16.gmra.mrb[36].mxu1 %v2268_v21  ;;  %v1172_v25 = vpop.permute.xlu0 %1171 }
 0x370   :  { %1416 = vmatprep.mubr.bf16.mxu1 %v2269_v24 }
 0x371   :  { %v1155_v28 = vpack.c.bf16 %v1110_v59, %v1109_v26  ;;  %v1177_v26 = vpop.permute.xlu1 %1176 }
 0x373   :  { %v1358_v29 = vsel %vm1356_vm6, %v1155_v28, 0 }
 0x374   :  { %2156 = vmatpush3.bf16.msra.mxu1 %v1358_v29 }
 0x377   :  { %1417 = vmatmul.mubr.bf16.gmra.mrb[40].mxu1 %v2271_v10 }
 0x378   :  { %1424 = vmatprep.mubr.bf16.mxu1 %v2272_v30 }
 0x37f   :  { %1425 = vmatmul.mubr.bf16.gmra.mrb[44].mxu1 %v2274_v33 }
 0x380   :  { %1432 = vmatprep.mubr.bf16.mxu1 %v2275_v35 }
 0x387   :  { %1433 = vmatmul.mubr.bf16.gmra.mrb[48].mxu1 %v2277_v36 }
 0x388   :  { %1440 = vmatprep.mubr.bf16.mxu1 %v1877_v12  ;;  %v1182_v12 = vpop.permute.xlu0 %1181 }
 0x38f   :  { %1441 = vmatmul.mubr.bf16.gmra.mrb[52].mxu1 %v1876_v37 }
 0x390   :  { %2157 = vmatprep.mubr.msk.bf16.mxu1 %vm2317_vm1, %v2316_v62 }
 0x397   :  { %2158 = vmatmul.mubr.msk.bf16.vlgmr.msra.gmra.mrb[56].mxu1 %vm1334_vm7, %v2280_v38 }
 0x398   :  { %2161 = vmatprep.mubr.msk.bf16.mxu1 %vm2317_vm1, %v2316_v62 }
 0x39f   :  { %2162 = vmatmul.mubr.msk.bf16.gmra.mrb[60].mxu1 %vm1334_vm7, %v2281_v27  ;;  %v1187_v27 = vpop.permute.xlu1 %1186 }
 0x3a0   :  { %2165 = vmatprep.mubr.msk.bf16.mxu1 %vm2317_vm1, %v2316_v62 }
 0x3a7   :  { %2166 = vmatmul.mubr.msk.bf16.gmra.mrb[64].mxu1 %vm1334_vm7, %v2282_v41 }
 0x3a8   :  { %2169 = vmatprep.mubr.msk.bf16.mxu1 %vm2317_vm1, %v2316_v62 }
 0x3af   :  { %2170 = vmatmul.mubr.msk.bf16.gmra.mrb[68].mxu1 %vm1334_vm7, %v2283_v42 }
 0x3b0   :  { %2173 = vmatprep.mubr.msk.bf16.mxu1 %vm2317_vm1, %v2316_v62 }
 0x3b7   :  { %2174 = vmatmul.mubr.msk.bf16.gmra.mrb[72].mxu1 %vm1334_vm7, %v2284_v45 }
 0x3b8   :  { %2177 = vmatprep.mubr.msk.bf16.mxu1 %vm2317_vm1, %v2316_v62 }
 0x3bf   :  { %2178 = vmatmul.mubr.msk.bf16.gmra.mrb[76].mxu1 %vm1334_vm7, %v2285_v52 }
 0x3c0   :  { %2181 = vmatprep.mubr.msk.bf16.mxu1 %vm2317_vm1, %v2316_v62 }
 0x3c7   :  { %2182 = vmatmul.mubr.msk.bf16.gmra.mrb[80].mxu1 %vm1334_vm7, %v2286_v46 }
 0x3c8   :  { %2203 = vmatprep.mubr.msk.bf16.mxu1 %vm826_vm5, %v2288_v49 }
 0x432   :  { %v1952_v50 = vpop.f32.mrb[28].mxu1 }
 0x433   :  { %v1953_v62 = vpop.f32.mrb[29].mxu1 }
 0x434   :  { %v1954_v51 = vadd.f32 %v1953_v62, %v1952_v50  ;;  %v1955_v55 = vpop.f32.mrb[30].mxu1 }
 0x435   :  { %v1956_v56 = vpop.f32.mrb[31].mxu1 }
 0x436   :  { %v1957_v57 = vadd.f32 %v1956_v56, %v1955_v55  ;;  %v1395_v23 = vadd.f32 %v1954_v51, %v1172_v25  ;;  %v1192_v51 = vpop.permute.xlu0 %1191 }
 0x438   :  { %v1398_v10 = vadd.f32 %v1957_v57, %v1177_v26  ;;  %v1197_v57 = vpop.permute.xlu1 %1196 }
 0x43a   :  { %v1958_v4 = vpop.f32.mrb[32].mxu1 }
 0x43b   :  { %v1959_v58 = vpop.f32.mrb[33].mxu1 }
 0x43c   :  { %v1960_v53 = vadd.f32 %v1959_v58, %v1958_v4  ;;  %v1961_v39 = vpop.f32.mrb[34].mxu1 }
 0x43d   :  { %v1962_v60 = vpop.f32.mrb[35].mxu1 }
 0x43e   :  { %v1963_v8 = vadd.f32 %v1962_v60, %v1961_v39  ;;  %v1403_v38 = vadd.f32 %v1960_v53, %v1182_v12 }
 0x440   :  { %v1406_v52 = vadd.f32 %v1963_v8, %v1187_v27 }
 0x442   :  { %v1964_v61 = vpop.f32.mrb[36].mxu1 }
 0x443   :  { %v1965_v0 = vpop.f32.mrb[37].mxu1 }
 0x444   :  { %v1966_v15 = vadd.f32 %v1965_v0, %v1964_v61  ;;  %v1967_v18 = vpop.f32.mrb[38].mxu1 }
 0x445   :  { %v1968_v40 = vpop.f32.mrb[39].mxu1 }
 0x446   :  { %v1969_v1 = vadd.f32 %v1968_v40, %v1967_v18  ;;  %v1411_v56 = vadd.f32 %v1966_v15, %v1192_v51  ;;  %v1202_v40 = vpop.permute.xlu0 %1201  ;;  %v2290_v51 = vld [vmem:[%s3059_s9 + $0x18] ss:$0 sps:$4 sm:$0x11]  }
 0x448   :  { %v1414_v39 = vadd.f32 %v1969_v1, %v1197_v57 }
 0x44a   :  { %v1970_v2 = vpop.f32.mrb[40].mxu1 }
 0x44b   :  { %v1971_v43 = vpop.f32.mrb[41].mxu1 }
 0x44c   :  { %v2997_v3 = vadd.f32 %v1971_v43, %v1970_v2  ;;  %v1973_v5 = vpop.f32.mrb[42].mxu1 }
 0x44d   :  { %v1974_v6 = vpop.f32.mrb[43].mxu1 }
 0x44e   :  { %v2999_v63 = vadd.f32 %v1974_v6, %v1973_v5  ;;  %v1419_v43 = vadd.f32 %v2997_v3, %v1202_v40  ;;  %v1207_v5 = vpop.permute.xlu1 %1206 }
 0x452   :  { %v1976_v32 = vpop.f32.mrb[44].mxu1  ;;  %v1217_v3 = vpop.permute.xlu1 %1216 }
 0x453   :  { %v1977_v7 = vpop.f32.mrb[45].mxu1 }
 0x454   :  { %v3001_v44 = vadd.f32 %v1977_v7, %v1976_v32  ;;  %v1979_v9 = vpop.f32.mrb[46].mxu1  ;;  %v1422_v7 = vadd.f32 %v2999_v63, %v1207_v5 }
 0x455   :  { %v1980_v13 = vpop.f32.mrb[47].mxu1 }
 0x456   :  { %v3003_v47 = vadd.f32 %v1980_v13, %v1979_v9 }
 0x458   :  { %v1430_v25 = vadd.f32 %v3003_v47, %v1217_v3 }
 0x45a   :  { %v1982_v14 = vpop.f32.mrb[48].mxu1 }
 0x45b   :  { %v1983_v16 = vpop.f32.mrb[49].mxu1 }
 0x45c   :  { %v3005_v17 = vadd.f32 %v1983_v16, %v1982_v14  ;;  %v1985_v11 = vpop.f32.mrb[50].mxu1 }
 0x45d   :  { %v1986_v19 = vpop.f32.mrb[51].mxu1 }
 0x45e   :  { %v3007_v48 = vadd.f32 %v1986_v19, %v1985_v11  ;;  %v1212_v11 = vpop.permute.xlu0 %1211 }
 0x462   :  { %v1988_v20 = vpop.f32.mrb[52].mxu1 }
 0x463   :  { %v1989_v21 = vpop.f32.mrb[53].mxu1 }
 0x464   :  { %v3009_v54 = vadd.f32 %v1989_v21, %v1988_v20  ;;  %v1991_v22 = vpop.f32.mrb[54].mxu1  ;;  %v1427_v20 = vadd.f32 %v3001_v44, %v1212_v11  ;;  %v1227_v44 = vpop.permute.xlu1 %1226 }
 0x465   :  { %v1992_v24 = vpop.f32.mrb[55].mxu1 }
 0x46a   :  { %v1482_v59 = vpop.f32.mrb[56].mxu1 }
 0x46b   :  { %v1483_v28 = vadd.f32 %v1482_v59, %v1395_v23  ;;  %v2159_v29 = vpop.f32.mrb[57].mxu1 }
 0x46c   :  { %v1485_v30 = vpop.f32.mrb[58].mxu1  ;;  %v1222_v29 = vpop.permute.xlu0 %1221 }
 0x46d   :  { %v1486_v33 = vadd.f32 %v1485_v30, %v1398_v10  ;;  %v2160_v35 = vpop.f32.mrb[59].mxu1  ;;  %v1536_v34 = vmax.f32 %v1483_v28, 0.0  ;;  %v1435_v30 = vadd.f32 %v3005_v17, %v1222_v29 }
 0x46f   :  { %v1537_v36 = vmax.f32 %v1486_v33, 0.0 }
 0x471   :  { %v1556_v37 = vpack.c.bf16 %v1537_v36, %v1536_v34  ;;  %v1438_v36 = vadd.f32 %v3007_v48, %v1227_v44 }
 0x472   :  { %v1490_v41 = vpop.f32.mrb[60].mxu1 }
 0x473   :  { %v1491_v42 = vadd.f32 %v1490_v41, %v1403_v38  ;;  %v2163_v45 = vpop.f32.mrb[61].mxu1  ;;  %2185 = vmatprep.subr.bf16.mxu0 %v1556_v37  ;;  %2207 = vmatprep.subr.bf16.mxu1 %v1556_v37  ;;  %v1232_v41 = vpop.permute.xlu0 %1231 }
 0x474   :  { %v1493_v46 = vpop.f32.mrb[62].mxu1  ;;  %2186 = vmatpush3.bf16.msra.mxu0 %v1556_v37  ;;  %2214 = vmatpush3.bf16.msra.mxu1 %v1556_v37  ;;  %v1443_v45 = vadd.f32 %v3009_v54, %v1232_v41  ;;  %v2289_v54 = vld [vmem:[%s3059_s9 + $0x8] sm:$0xff]  }
 0x475   :  { %v1494_v31 = vadd.f32 %v1493_v46, %v1406_v52  ;;  %v2164_v49 = vpop.f32.mrb[63].mxu1  ;;  %v1538_v50 = vmax.f32 %v1491_v42, 0.0 }
 0x477   :  { %v1539_v62 = vmax.f32 %v1494_v31, 0.0 }
 0x479   :  { %v1557_v55 = vpack.c.bf16 %v1539_v62, %v1538_v50 }
 0x47a   :  { %v1498_v4 = vpop.f32.mrb[64].mxu1 }
 0x47b   :  { %v1499_v58 = vadd.f32 %v1498_v4, %v1411_v56  ;;  %v2167_v53 = vpop.f32.mrb[65].mxu1  ;;  %2187 = vmatprep.subr.bf16.mxu0 %v1557_v55  ;;  %2208 = vmatprep.subr.bf16.mxu1 %v1557_v55  ;;  %v1578_v56 = vpop.permute.xlu0 %1577 }
 0x47c   :  { %v1501_v60 = vpop.f32.mrb[66].mxu1  ;;  %2188 = vmatpush3.bf16.msra.mxu0 %v1557_v55  ;;  %2215 = vmatpush3.bf16.msra.mxu1 %v1557_v55  ;;  %v1573_v55 = vpop.permute.xlu1 %1572 }
 0x47d   :  { %v1502_v8 = vadd.f32 %v1501_v60, %v1414_v39  ;;  %v2168_v61 = vpop.f32.mrb[67].mxu1  ;;  %v1540_v0 = vmax.f32 %v1499_v58, 0.0 }
 0x47f   :  { %v1541_v18 = vmax.f32 %v1502_v8, 0.0  ;;  %v1588_v4 = vpop.permute.xlu0 %1587 }
 0x480   :  { %v1583_v57 = vpop.permute.xlu1 %1582 }
 0x481   :  { %v1558_v2 = vpack.c.bf16 %v1541_v18, %v1540_v0 }
 0x482   :  { %v1506_v15 = vpop.f32.mrb[68].mxu1 }
 0x483   :  { %v1507_v6 = vadd.f32 %v1506_v15, %v1419_v43  ;;  %v2171_v32 = vpop.f32.mrb[69].mxu1  ;;  %2189 = vmatprep.subr.bf16.mxu0 %v1558_v2  ;;  %2209 = vmatprep.subr.bf16.mxu1 %v1558_v2  ;;  %v1724_v53 = vpop.permute.xlu0 %1723 }
 0x484   :  { %v1509_v1 = vpop.f32.mrb[70].mxu1  ;;  %2190 = vmatpush3.bf16.msra.mxu0 %v1558_v2  ;;  %2216 = vmatpush3.bf16.msra.mxu1 %v1558_v2  ;;  %v1719_v58 = vpop.permute.xlu1 %1718 }
 0x485   :  { %v1510_v9 = vadd.f32 %v1509_v1, %v1422_v7  ;;  %v2172_v13 = vpop.f32.mrb[71].mxu1  ;;  %v1542_v14 = vmax.f32 %v1507_v6, 0.0 }
 0x487   :  { %v1543_v16 = vmax.f32 %v1510_v9, 0.0  ;;  %v1729_v60 = vpop.permute.xlu0 %1728 }
 0x488   :  { %v1593_v39 = vpop.permute.xlu1 %1592 }
 0x489   :  { %v1559_v19 = vpack.c.bf16 %v1543_v16, %v1542_v14 }
 0x48a   :  { %v1514_v21 = vpop.f32.mrb[72].mxu1 }
 0x48b   :  { %v1515_v22 = vadd.f32 %v1514_v21, %v1427_v20  ;;  %v2175_v24 = vpop.f32.mrb[73].mxu1  ;;  %2191 = vmatprep.subr.bf16.mxu0 %v1559_v19  ;;  %2210 = vmatprep.subr.bf16.mxu1 %v1559_v19  ;;  %v1734_v61 = vpop.permute.xlu0 %1733 }
 0x48c   :  { %v1517_v63 = vpop.f32.mrb[74].mxu1  ;;  %2192 = vmatpush3.bf16.msra.mxu0 %v1559_v19  ;;  %2217 = vmatpush3.bf16.msra.mxu1 %v1559_v19  ;;  %v1598_v8 = vpop.permute.xlu1 %1597 }
 0x48d   :  { %v1518_v23 = vadd.f32 %v1517_v63, %v1430_v25  ;;  %v2176_v26 = vpop.f32.mrb[75].mxu1  ;;  %v1544_v59 = vmax.f32 %v1515_v22, 0.0 }
 0x48f   :  { %v1545_v28 = vmax.f32 %v1518_v23, 0.0  ;;  %v1739_v23 = vpop.permute.xlu0 %1738 }
 0x490   :  { %v1603_v21 = vpop.permute.xlu1 %1602 }
 0x491   :  { %v1560_v10 = vpack.c.bf16 %v1545_v28, %v1544_v59 }
 0x492   :  { %v1522_v33 = vpop.f32.mrb[76].mxu1 }
 0x493   :  { %v1523_v35 = vadd.f32 %v1522_v33, %v1435_v30  ;;  %v2179_v34 = vpop.f32.mrb[77].mxu1  ;;  %2193 = vmatprep.subr.bf16.mxu0 %v1560_v10  ;;  %2211 = vmatprep.subr.bf16.mxu1 %v1560_v10 }
 0x494   :  { %v1525_v47 = vpop.f32.mrb[78].mxu1  ;;  %2194 = vmatpush3.bf16.msra.mxu0 %v1560_v10  ;;  %2218 = vmatpush3.bf16.msra.mxu1 %v1560_v10 }
 0x495   :  { %v1526_v12 = vadd.f32 %v1525_v47, %v1438_v36  ;;  %v2180_v37 = vpop.f32.mrb[79].mxu1  ;;  %v1546_v38 = vmax.f32 %v1523_v35, 0.0  ;;  %v1744_v35 = vpop.permute.xlu1 %1743 }
 0x497   :  { %v1547_v27 = vmax.f32 %v1526_v12, 0.0  ;;  %v1749_v12 = vpop.permute.xlu0 %1748 }
 0x499   :  { %v1561_v42 = vpack.c.bf16 %v1547_v27, %v1546_v38 }
 0x49a   :  { %v1530_v17 = vpop.f32.mrb[80].mxu1 }
 0x49b   :  { %v1531_v52 = vadd.f32 %v1530_v17, %v1443_v45  ;;  %2195 = vmatprep.subr.bf16.mxu0 %v1561_v42  ;;  %2212 = vmatprep.subr.bf16.mxu1 %v1561_v42  ;;  %v2183_v46 = vpop.f32.mrb[81].mxu1 }
 0x49c   :  { %2196 = vmatpush3.bf16.msra.mxu0 %v1561_v42  ;;  %2219 = vmatpush3.bf16.msra.mxu1 %v1561_v42  ;;  %v1533_v31 = vpop.f32.mrb[82].mxu1 }
 0x49d   :  { %v1548_v48 = vmax.f32 %v1531_v52, 0.0  ;;  %v2184_v49 = vpop.f32.mrb[83].mxu1 }
 0x49f   :  { %v1562_v50 = vpack.c.bf16 %v1548_v48, %v1548_v48 }
 0x4a1   :  { %2222 = vmatprep.subr.msk.bf16.mxu0 %vm884_vm4, %v1562_v50  ;;  %2223 = vmatprep.subr.msk.bf16.mxu1 %vm884_vm4, %v1562_v50  ;;  %v1636_v62 = vsel %vm884_vm4, %v1562_v50, 0 }
 0x4a2   :  { %2198 = vmatpush3.bf16.msra.mxu0 %v1636_v62  ;;  %2220 = vmatpush3.bf16.msra.mxu1 %v1636_v62  ;;  %v1780_v62 = vstv %s3062_s12 }
 0x4a5   :  { %2200 = vmatmul.mubr.msk.bf16.vlgmr.msra.gmra.mrb[84].mxu0 %vm826_vm5, %v2289_v54  ;;  %2204 = vmatmul.mubr.msk.bf16.vlgmr.msra.gmra.mrb[84].mxu1 %vm826_vm5, %v2290_v51 }
 0x578   :  { %v2201_v0 = vpop.f32.mrb[84].mxu0  ;;  %v2205_v18 = vpop.f32.mrb[84].mxu1 }
 0x579   :  { %v1681_v40 = vadd.f32 %v2201_v0, %v1583_v57  ;;  %v1672_v2 = vpop.f32.mrb[85].mxu0  ;;  %v1688_v43 = vpop.f32.mrb[85].mxu1  ;;  %v1697_v24 = vadd.f32 %v2205_v18, %v1603_v21 }
 0x57a   :  { %v1673_v5 = vadd.f32 %v1672_v2, %v1573_v55  ;;  %v2202_v15 = vpop.f32.mrb[86].mxu0  ;;  %v2206_v6 = vpop.f32.mrb[86].mxu1  ;;  %v1689_v14 = vadd.f32 %v1688_v43, %v1593_v39 }
 0x57b   :  { %v1684_v32 = vadd.f32 %v2202_v15, %v1588_v4  ;;  %v1675_v7 = vpop.f32.mrb[87].mxu0  ;;  %v1691_v1 = vpop.f32.mrb[87].mxu1  ;;  %v1704_v9 = vmax.f32 %v1681_v40, 0.0  ;;  %v1708_v44 = vmax.f32 %v1697_v24, 0.0 }
 0x57c   :  { %v1702_v13 = vmax.f32 %v1673_v5, 0.0  ;;  %v1676_v16 = vadd.f32 %v1675_v7, %v1578_v56  ;;  %v1692_v3 = vadd.f32 %v1691_v1, %v1598_v8  ;;  %v1706_v25 = vmax.f32 %v1689_v14, 0.0 }
 0x57d   :  { %v1705_v19 = vmax.f32 %v1684_v32, 0.0  ;;  %v1753_v22 = vmul.f32 %v1729_v60, %v1704_v9  ;;  %v1757_v38 = vmul.f32 %v1749_v12, %v1708_v44 }
 0x57e   :  { %v1751_v11 = vmul.f32 %v1719_v58, %v1702_v13  ;;  %v1703_v20 = vmax.f32 %v1676_v16, 0.0  ;;  %v1707_v29 = vmax.f32 %v1692_v3, 0.0  ;;  %v1755_v33 = vmul.f32 %v1739_v23, %v1706_v25 }
 0x57f   :  { %v1754_v59 = vmul.f32 %v1734_v61, %v1705_v19  ;;  %v1762_v30 = vsel %vm1758_vm8, %v1753_v22, 0.0  ;;  %v1771_v17 = vsel %vm1770_vm9, %v1757_v38, 0.0 }
 0x580   :  { %v1752_v63 = vmul.f32 %v1724_v53, %v1703_v20  ;;  %v1759_v26 = vsel %vm1758_vm8, %v1751_v11, 0.0  ;;  %v1756_v47 = vmul.f32 %v1744_v35, %v1707_v29  ;;  %v1766_v27 = vsel %vm1758_vm8, %v1755_v33, 0.0 }
 0x581   :  { %v1764_v36 = vsel %vm1758_vm8, %v1754_v59, 0.0 }
 0x582   :  { %v1760_v28 = vsel %vm1758_vm8, %v1752_v63, 0.0  ;;  %v1768_v42 = vsel %vm1758_vm8, %v1756_v47, 0.0 }
 0x583   :  { %v1761_v10 = vadd.f32 %v1760_v28, %v1759_v26 }
 0x585   :  { %v1763_v34 = vadd.f32 %v1762_v30, %v1761_v10 }
 0x587   :  { %v1765_v37 = vadd.f32 %v1764_v36, %v1763_v34 }
 0x589   :  { %v1767_v41 = vadd.f32 %v1766_v27, %v1765_v37 }
 0x58b   :  { %v1769_v45 = vadd.f32 %v1768_v42, %v1767_v41 }
 0x58d   :  { %v1772_v52 = vadd.f32 %v1771_v17, %v1769_v45 }
 0x58f   :  { %v1773_v46 = vrot.slane %v1772_v52, 4 }
 0x591   :  { %v1774_v31 = vadd.f32 %v1773_v46, %v1772_v52 }
 0x593   :  { %v1775_v48 = vrot.slane %v1774_v31, 2 }
 0x595   :  { %v1776_v49 = vadd.f32 %v1775_v48, %v1774_v31 }
 0x597   :  { %v1777_v50 = vrot.slane %v1776_v49, 1 }
 0x599   :  { %v1778_v54 = vadd.f32 %v1777_v50, %v1776_v49 }
 0x59b   :  { %v1781_v51 = vadd.f32 %v1780_v62, %v1778_v54 }
 0x59d   :  { %1783 = vst.msk [vmem:[#allocation3] sm:$0x1] %vm1782_vm10, %v1781_v51 }
 0x59e   :  { %2302 = shalt.err (!%p2299_p4)
}
 0x59f   :  { %s2303_s5 = scalar_lea.hbm %s3063_s13, 16 }
 0x5a0   :  { %p2304_p5 = scmp.ne.s32.totalorder %s3063_s13, %s2303_s5  ;;  %p2307_p6 = scmp.lt.u32.totalorder %s2303_s5, %s3063_s13 }
 0x5a2   :  { %p2309_p7 = pnand %p2307_p6, %p2304_p5 }
 0x5a4   :  { %2312 = shalt.err (!%p2309_p7)
}
 0x5a5   :  { %1793 = dma.vmem_to_hbm [thread:$0]  %s1791_s16, 16, %s3063_s13, [#allocation4]  }
 0x5a6   :  { %2313 = dma.done.wait [#allocation4], 16  }
 0x5a7   :  { %2314 = vsyncadd [#allocation4], 4294967280 }
 0x5a8   :  { %1797 = vsyncpa [#allocation4], 1 }

</bundles_post_ra>
